<compile_context>
chip_gen: v5e
topology: v5e:2x2
jax: 0.10.0
libtpu: 0.0.40
codegen_flags: <defaults>
</compile_context>

<pallas_src>
import jax
import jax.numpy as jnp
from jax import lax
from jax.experimental import pallas as pl
from jax.experimental.pallas import tpu as pltpu

H_PAD = 128                      # lane-aligned width of hidden state / each gate slot
B_PAD = 8                        # sublane-aligned batch rows inside the kernel
D_PAD = 128                      # lane-aligned input feature dim inside the kernel
GATE_SLOT_ORDER = (0, 1, 3, 2)   # PyTorch gate index (i,f,g,o) placed into slots [i|f|o|g]


# ----------------------------- Pallas kernel --------------------------------
def lstm_kernel(x_ref, wx_ref, whh_ref, b_ref, out_ref):
    # x_ref:   (T*B_PAD, D_PAD)   time-major rows (row t*B_PAD + b), zero-padded
    # wx_ref:  (D_PAD, 4*H_PAD)   fused (W_ih @ W0)^T per gate, slots [i|f|o|g], zero-padded
    # whh_ref: (H_PAD, 4*H_PAD)   fused hidden->gate weights, slots [i|f|o|g], zero-padded
    # b_ref:   (1, 4*H_PAD)       fused (W_ih @ b0 + b_ih + b_hh), zero-padded
    # out_ref: (T, B_PAD, H_PAD)  h_t per step (padded lanes/rows stay exactly 0 / unused)
    f32 = jnp.float32
    T, Bp, Hp = out_ref.shape

    # ---- hoisted, h-independent work: one batched MXU dot over all T*Bp rows ----
    gx = jnp.dot(x_ref[...], wx_ref[...], preferred_element_type=f32) + b_ref[...]

    # ---- serial recurrence: exactly one MXU dot per timestep ----
    h = jnp.zeros((Bp, Hp), f32)
    c = jnp.zeros((Bp, Hp), f32)
    for t in range(T):   # T static & small -> full unroll, static lane-tile-aligned slices
        pre = gx[t * Bp:(t + 1) * Bp, :] + jnp.dot(
            h, whh_ref[...], preferred_element_type=f32)          # (Bp, 4*Hp)
        sig = jax.nn.sigmoid(pre[:, :3 * Hp])                     # fused [i|f|o] activation
        g = jnp.tanh(pre[:, 3 * Hp:])                             # g slot
        i = sig[:, 0:Hp]
        f = sig[:, Hp:2 * Hp]
        o = sig[:, 2 * Hp:3 * Hp]
        c = f * c + i * g                                         # padded lanes stay 0
        h = o * jnp.tanh(c)
        out_ref[t] = h                                            # full (8,128) unmasked store


# ------------------------------ wrapper --------------------------------------
def lstm_module_forward(x, kparams, hidden_size):
    """x: (B, T, D_in) float32 -> lstm_output: (B, T, hidden_size) float32."""
    B, T, Din = x.shape
    xp = jnp.zeros((T, B_PAD, D_PAD), jnp.float32)
    xp = xp.at[:, :B, :Din].set(jnp.transpose(x, (1, 0, 2)))      # time-major, tile-padded
    x_flat = xp.reshape(T * B_PAD, D_PAD)

    vmem = pl.BlockSpec(memory_space=pltpu.MemorySpace.VMEM)
    out = pl.pallas_call(
        lstm_kernel,
        out_shape=jax.ShapeDtypeStruct((T, B_PAD, H_PAD), jnp.float32),
        in_specs=[vmem] * 4,
        out_specs=vmem,
    )(x_flat, kparams["wx"], kparams["whh"], kparams["b"])

    return jnp.transpose(out, (1, 0, 2))[:B, :, :hidden_size]     # (B, T, H)


# -------------------------- parameter construction ---------------------------
def init_raw_params(key, input_size=3, hidden_size=34):
    """Deterministic synthetic init mirroring nn.Linear / nn.LSTM shapes (PyTorch layout)."""
    H, D = hidden_size, input_size
    ks = jax.random.split(key, 6)
    kf = 1.0 / jnp.sqrt(jnp.float32(D))
    kl = 1.0 / jnp.sqrt(jnp.float32(H))
    return dict(
        fc0_w=jax.random.uniform(ks[0], (H, D), jnp.float32, -kf, kf),      # (out, in)
        fc0_b=jax.random.uniform(ks[1], (H,), jnp.float32, -kf, kf),
        w_ih=jax.random.uniform(ks[2], (4 * H, H), jnp.float32, -kl, kl),   # gates i,f,g,o
        w_hh=jax.random.uniform(ks[3], (4 * H, H), jnp.float32, -kl, kl),
        b_ih=jax.random.uniform(ks[4], (4 * H,), jnp.float32, -kl, kl),
        b_hh=jax.random.uniform(ks[5], (4 * H,), jnp.float32, -kl, kl),
    )


def build_kernel_params(raw, hidden_size, input_size):
    """Fold fc0 into the input->gate projection, fuse the 4 gates, pad to lane tiles."""
    H, D = hidden_size, input_size
    hi = lax.Precision.HIGHEST
    w0, b0 = raw["fc0_w"], raw["fc0_b"]                          # (H, D), (H,)

    wx = jnp.zeros((D_PAD, 4 * H_PAD), jnp.float32)
    b = jnp.zeros((1, 4 * H_PAD), jnp.float32)
    whh = jnp.zeros((H_PAD, 4 * H_PAD), jnp.float32)
    for slot, g in enumerate(GATE_SLOT_ORDER):
        wih_g = raw["w_ih"][g * H:(g + 1) * H, :]                # (H, H)
        w_fused = jnp.dot(wih_g, w0, precision=hi)               # (H, D) == W_ih_g @ W0
        b_fused = (jnp.dot(wih_g, b0, precision=hi)
                   + raw["b_ih"][g * H:(g + 1) * H] + raw["b_hh"][g * H:(g + 1) * H])
        wx = wx.at[:D, slot * H_PAD:slot * H_PAD + H].set(w_fused.T)
        b = b.at[0, slot * H_PAD:slot * H_PAD + H].set(b_fused)
        whh = whh.at[:H, slot * H_PAD:slot * H_PAD + H].set(
            jnp.transpose(raw["w_hh"][g * H:(g + 1) * H, :]))

    return dict(wx=wx, whh=whh, b=b)


# --------------------------- pure-JAX reference -------------------------------
def reference_forward(x, raw, hidden_size):
    """Mirrors nn.Linear + nn.LSTM(batch_first=True) with zero initial state."""
    H = hidden_size
    B, T, _ = x.shape
    l1 = jnp.einsum("btd,hd->bth", x, raw["fc0_w"]) + raw["fc0_b"]
    w_ih, w_hh, b_ih, b_hh = raw["w_ih"], raw["w_hh"], raw["b_ih"], raw["b_hh"]

    def step(carry, l1_t):
        h, c = carry
        z = l1_t @ w_ih.T + b_ih + h @ w_hh.T + b_hh      # (B, 4H), gate order i,f,g,o
        i = jax.nn.sigmoid(z[:, 0:H])
        f = jax.nn.sigmoid(z[:, H:2 * H])
        g = jnp.tanh(z[:, 2 * H:3 * H])
        o = jax.nn.sigmoid(z[:, 3 * H:4 * H])
        c_new = f * c + i * g
        h_new = o * jnp.tanh(c_new)
        return (h_new, c_new), h_new

    h0 = jnp.zeros((B, H), jnp.float32)
    c0 = jnp.zeros((B, H), jnp.float32)
    _, ys = lax.scan(step, (h0, c0), jnp.transpose(l1, (1, 0, 2)))
    return jnp.transpose(ys, (1, 0, 2))


# ------------------------------------ main ------------------------------------
if __name__ == "__main__":
    B, T = 2, 8
    INPUT_SIZE, HIDDEN_SIZE = 3, 34            # module __init__ defaults

    key = jax.random.PRNGKey(0)
    kx, kp = jax.random.split(key)
    x = jax.random.normal(kx, (B, T, INPUT_SIZE), dtype=jnp.float32)

    raw = init_raw_params(kp, input_size=INPUT_SIZE, hidden_size=HIDDEN_SIZE)
    kparams = build_kernel_params(raw, HIDDEN_SIZE, INPUT_SIZE)

    out = jax.block_until_ready(lstm_module_forward(x, kparams, HIDDEN_SIZE))
    ref = jax.block_until_ready(reference_forward(x, raw, HIDDEN_SIZE))

    assert out.shape == (B, T, HIDDEN_SIZE)
    assert jnp.allclose(out, ref, rtol=1e-4, atol=2e-5), "kernel/reference mismatch"

    print("KERNEL_OK")
</pallas_src>

<mosaic_0001>
module attributes {stable_mosaic.version = 11 : i64} {
  func.func @lstm_kernel(%arg0: memref<64x128xf32, #tpu.memory_space<vmem>>, %arg1: memref<128x512xf32, #tpu.memory_space<vmem>>, %arg2: memref<128x512xf32, #tpu.memory_space<vmem>>, %arg3: memref<1x512xf32, #tpu.memory_space<vmem>>, %arg4: memref<8x8x128xf32, #tpu.memory_space<vmem>>) attributes {dimension_semantics = [], scalar_prefetch = 0 : i64, scratch_operands = 0 : i64, tpu.core_type = #tpu.core_type<tc>} {
    %c0 = arith.constant 0 : index
    %c0_0 = arith.constant 0 : index
    %0 = vector.load %arg0[%c0, %c0_0] : memref<64x128xf32, #tpu.memory_space<vmem>>, vector<64x128xf32>
    %c0_1 = arith.constant 0 : index
    %c0_2 = arith.constant 0 : index
    %1 = vector.load %arg1[%c0_1, %c0_2] : memref<128x512xf32, #tpu.memory_space<vmem>>, vector<128x512xf32>
    %cst = arith.constant dense<0.000000e+00> : vector<64x512xf32>
    %2 = tpu.matmul %0, %1, %cst {dimension_numbers = #tpu.dot_dimension_numbers<[1], [0], [0], [1], [0, 0, 1, 1], [], []>} : vector<64x128xf32>, vector<128x512xf32>, vector<64x512xf32> -> vector<64x512xf32>
    %c0_3 = arith.constant 0 : index
    %c0_4 = arith.constant 0 : index
    %3 = vector.load %arg3[%c0_3, %c0_4] : memref<1x512xf32, #tpu.memory_space<vmem>>, vector<1x512xf32>
    %4 = vector.broadcast %3 : vector<1x512xf32> to vector<64x512xf32>
    %5 = arith.addf %2, %4 : vector<64x512xf32>
    %cst_5 = arith.constant 0.000000e+00 : f32
    %6 = vector.broadcast %cst_5 : f32 to vector<8x128xf32>
    %cst_6 = arith.constant 0.000000e+00 : f32
    %7 = vector.broadcast %cst_6 : f32 to vector<8x128xf32>
    %8 = vector.extract_strided_slice %5 {offsets = [0, 0], sizes = [8, 512], strides = [1, 1]} : vector<64x512xf32> to vector<8x512xf32>
    %c0_7 = arith.constant 0 : index
    %c0_8 = arith.constant 0 : index
    %9 = vector.load %arg2[%c0_7, %c0_8] : memref<128x512xf32, #tpu.memory_space<vmem>>, vector<128x512xf32>
    %cst_9 = arith.constant dense<0.000000e+00> : vector<8x512xf32>
    %10 = tpu.matmul %6, %9, %cst_9 {dimension_numbers = #tpu.dot_dimension_numbers<[1], [0], [0], [1], [0, 0, 1, 1], [], []>} : vector<8x128xf32>, vector<128x512xf32>, vector<8x512xf32> -> vector<8x512xf32>
    %11 = arith.addf %8, %10 : vector<8x512xf32>
    %12 = vector.extract_strided_slice %11 {offsets = [0, 0], sizes = [8, 384], strides = [1, 1]} : vector<8x512xf32> to vector<8x384xf32>
    %13 = arith.negf %12 : vector<8x384xf32>
    %14 = math.exp %13 : vector<8x384xf32>
    %cst_10 = arith.constant 1.000000e+00 : f32
    %15 = vector.broadcast %cst_10 : f32 to vector<8x384xf32>
    %16 = arith.addf %15, %14 : vector<8x384xf32>
    %17 = arith.divf %15, %16 : vector<8x384xf32>
    %18 = vector.extract_strided_slice %11 {offsets = [0, 384], sizes = [8, 128], strides = [1, 1]} : vector<8x512xf32> to vector<8x128xf32>
    %19 = math.tanh %18 : vector<8x128xf32>
    %20 = vector.extract_strided_slice %17 {offsets = [0, 0], sizes = [8, 128], strides = [1, 1]} : vector<8x384xf32> to vector<8x128xf32>
    %21 = vector.extract_strided_slice %17 {offsets = [0, 128], sizes = [8, 128], strides = [1, 1]} : vector<8x384xf32> to vector<8x128xf32>
    %22 = vector.extract_strided_slice %17 {offsets = [0, 256], sizes = [8, 128], strides = [1, 1]} : vector<8x384xf32> to vector<8x128xf32>
    %23 = arith.mulf %21, %7 : vector<8x128xf32>
    %24 = arith.mulf %20, %19 : vector<8x128xf32>
    %25 = arith.addf %23, %24 : vector<8x128xf32>
    %26 = math.tanh %25 : vector<8x128xf32>
    %27 = arith.mulf %22, %26 : vector<8x128xf32>
    %c0_11 = arith.constant 0 : index
    %c0_12 = arith.constant 0 : index
    %c0_13 = arith.constant 0 : index
    %28 = vector.load %arg4[%c0_11, %c0_12, %c0_13] : memref<8x8x128xf32, #tpu.memory_space<vmem>>, vector<1x8x128xf32>
    %29 = vector.shape_cast %28 : vector<1x8x128xf32> to vector<8x128xf32>
    %30 = vector.shape_cast %27 : vector<8x128xf32> to vector<1x8x128xf32>
    tpu.vector_store %arg4[%c0_11, %c0_12, %c0_13], %30 {strides = array<i32>} : memref<8x8x128xf32, #tpu.memory_space<vmem>>, vector<1x8x128xf32>,
    %31 = vector.extract_strided_slice %5 {offsets = [8, 0], sizes = [8, 512], strides = [1, 1]} : vector<64x512xf32> to vector<8x512xf32>
    %c0_14 = arith.constant 0 : index
    %c0_15 = arith.constant 0 : index
    %32 = vector.load %arg2[%c0_14, %c0_15] : memref<128x512xf32, #tpu.memory_space<vmem>>, vector<128x512xf32>
    %cst_16 = arith.constant dense<0.000000e+00> : vector<8x512xf32>
    %33 = tpu.matmul %27, %32, %cst_16 {dimension_numbers = #tpu.dot_dimension_numbers<[1], [0], [0], [1], [0, 0, 1, 1], [], []>} : vector<8x128xf32>, vector<128x512xf32>, vector<8x512xf32> -> vector<8x512xf32>
    %34 = arith.addf %31, %33 : vector<8x512xf32>
    %35 = vector.extract_strided_slice %34 {offsets = [0, 0], sizes = [8, 384], strides = [1, 1]} : vector<8x512xf32> to vector<8x384xf32>
    %36 = arith.negf %35 : vector<8x384xf32>
    %37 = math.exp %36 : vector<8x384xf32>
    %cst_17 = arith.constant 1.000000e+00 : f32
    %38 = vector.broadcast %cst_17 : f32 to vector<8x384xf32>
    %39 = arith.addf %38, %37 : vector<8x384xf32>
    %40 = arith.divf %38, %39 : vector<8x384xf32>
    %41 = vector.extract_strided_slice %34 {offsets = [0, 384], sizes = [8, 128], strides = [1, 1]} : vector<8x512xf32> to vector<8x128xf32>
    %42 = math.tanh %41 : vector<8x128xf32>
    %43 = vector.extract_strided_slice %40 {offsets = [0, 0], sizes = [8, 128], strides = [1, 1]} : vector<8x384xf32> to vector<8x128xf32>
    %44 = vector.extract_strided_slice %40 {offsets = [0, 128], sizes = [8, 128], strides = [1, 1]} : vector<8x384xf32> to vector<8x128xf32>
    %45 = vector.extract_strided_slice %40 {offsets = [0, 256], sizes = [8, 128], strides = [1, 1]} : vector<8x384xf32> to vector<8x128xf32>
    %46 = arith.mulf %44, %25 : vector<8x128xf32>
    %47 = arith.mulf %43, %42 : vector<8x128xf32>
    %48 = arith.addf %46, %47 : vector<8x128xf32>
    %49 = math.tanh %48 : vector<8x128xf32>
    %50 = arith.mulf %45, %49 : vector<8x128xf32>
    %c1 = arith.constant 1 : index
    %c0_18 = arith.constant 0 : index
    %c0_19 = arith.constant 0 : index
    %51 = vector.load %arg4[%c1, %c0_18, %c0_19] : memref<8x8x128xf32, #tpu.memory_space<vmem>>, vector<1x8x128xf32>
    %52 = vector.shape_cast %51 : vector<1x8x128xf32> to vector<8x128xf32>
    %53 = vector.shape_cast %50 : vector<8x128xf32> to vector<1x8x128xf32>
    tpu.vector_store %arg4[%c1, %c0_18, %c0_19], %53 {strides = array<i32>} : memref<8x8x128xf32, #tpu.memory_space<vmem>>, vector<1x8x128xf32>,
    %54 = vector.extract_strided_slice %5 {offsets = [16, 0], sizes = [8, 512], strides = [1, 1]} : vector<64x512xf32> to vector<8x512xf32>
    %c0_20 = arith.constant 0 : index
    %c0_21 = arith.constant 0 : index
    %55 = vector.load %arg2[%c0_20, %c0_21] : memref<128x512xf32, #tpu.memory_space<vmem>>, vector<128x512xf32>
    %cst_22 = arith.constant dense<0.000000e+00> : vector<8x512xf32>
    %56 = tpu.matmul %50, %55, %cst_22 {dimension_numbers = #tpu.dot_dimension_numbers<[1], [0], [0], [1], [0, 0, 1, 1], [], []>} : vector<8x128xf32>, vector<128x512xf32>, vector<8x512xf32> -> vector<8x512xf32>
    %57 = arith.addf %54, %56 : vector<8x512xf32>
    %58 = vector.extract_strided_slice %57 {offsets = [0, 0], sizes = [8, 384], strides = [1, 1]} : vector<8x512xf32> to vector<8x384xf32>
    %59 = arith.negf %58 : vector<8x384xf32>
    %60 = math.exp %59 : vector<8x384xf32>
    %cst_23 = arith.constant 1.000000e+00 : f32
    %61 = vector.broadcast %cst_23 : f32 to vector<8x384xf32>
    %62 = arith.addf %61, %60 : vector<8x384xf32>
    %63 = arith.divf %61, %62 : vector<8x384xf32>
    %64 = vector.extract_strided_slice %57 {offsets = [0, 384], sizes = [8, 128], strides = [1, 1]} : vector<8x512xf32> to vector<8x128xf32>
    %65 = math.tanh %64 : vector<8x128xf32>
    %66 = vector.extract_strided_slice %63 {offsets = [0, 0], sizes = [8, 128], strides = [1, 1]} : vector<8x384xf32> to vector<8x128xf32>
    %67 = vector.extract_strided_slice %63 {offsets = [0, 128], sizes = [8, 128], strides = [1, 1]} : vector<8x384xf32> to vector<8x128xf32>
    %68 = vector.extract_strided_slice %63 {offsets = [0, 256], sizes = [8, 128], strides = [1, 1]} : vector<8x384xf32> to vector<8x128xf32>
    %69 = arith.mulf %67, %48 : vector<8x128xf32>
    %70 = arith.mulf %66, %65 : vector<8x128xf32>
    %71 = arith.addf %69, %70 : vector<8x128xf32>
    %72 = math.tanh %71 : vector<8x128xf32>
    %73 = arith.mulf %68, %72 : vector<8x128xf32>
    %c2 = arith.constant 2 : index
    %c0_24 = arith.constant 0 : index
    %c0_25 = arith.constant 0 : index
    %74 = vector.load %arg4[%c2, %c0_24, %c0_25] : memref<8x8x128xf32, #tpu.memory_space<vmem>>, vector<1x8x128xf32>
    %75 = vector.shape_cast %74 : vector<1x8x128xf32> to vector<8x128xf32>
    %76 = vector.shape_cast %73 : vector<8x128xf32> to vector<1x8x128xf32>
    tpu.vector_store %arg4[%c2, %c0_24, %c0_25], %76 {strides = array<i32>} : memref<8x8x128xf32, #tpu.memory_space<vmem>>, vector<1x8x128xf32>,
    %77 = vector.extract_strided_slice %5 {offsets = [24, 0], sizes = [8, 512], strides = [1, 1]} : vector<64x512xf32> to vector<8x512xf32>
    %c0_26 = arith.constant 0 : index
    %c0_27 = arith.constant 0 : index
    %78 = vector.load %arg2[%c0_26, %c0_27] : memref<128x512xf32, #tpu.memory_space<vmem>>, vector<128x512xf32>
    %cst_28 = arith.constant dense<0.000000e+00> : vector<8x512xf32>
    %79 = tpu.matmul %73, %78, %cst_28 {dimension_numbers = #tpu.dot_dimension_numbers<[1], [0], [0], [1], [0, 0, 1, 1], [], []>} : vector<8x128xf32>, vector<128x512xf32>, vector<8x512xf32> -> vector<8x512xf32>
    %80 = arith.addf %77, %79 : vector<8x512xf32>
    %81 = vector.extract_strided_slice %80 {offsets = [0, 0], sizes = [8, 384], strides = [1, 1]} : vector<8x512xf32> to vector<8x384xf32>
    %82 = arith.negf %81 : vector<8x384xf32>
    %83 = math.exp %82 : vector<8x384xf32>
    %cst_29 = arith.constant 1.000000e+00 : f32
    %84 = vector.broadcast %cst_29 : f32 to vector<8x384xf32>
    %85 = arith.addf %84, %83 : vector<8x384xf32>
    %86 = arith.divf %84, %85 : vector<8x384xf32>
    %87 = vector.extract_strided_slice %80 {offsets = [0, 384], sizes = [8, 128], strides = [1, 1]} : vector<8x512xf32> to vector<8x128xf32>
    %88 = math.tanh %87 : vector<8x128xf32>
    %89 = vector.extract_strided_slice %86 {offsets = [0, 0], sizes = [8, 128], strides = [1, 1]} : vector<8x384xf32> to vector<8x128xf32>
    %90 = vector.extract_strided_slice %86 {offsets = [0, 128], sizes = [8, 128], strides = [1, 1]} : vector<8x384xf32> to vector<8x128xf32>
    %91 = vector.extract_strided_slice %86 {offsets = [0, 256], sizes = [8, 128], strides = [1, 1]} : vector<8x384xf32> to vector<8x128xf32>
    %92 = arith.mulf %90, %71 : vector<8x128xf32>
    %93 = arith.mulf %89, %88 : vector<8x128xf32>
    %94 = arith.addf %92, %93 : vector<8x128xf32>
    %95 = math.tanh %94 : vector<8x128xf32>
    %96 = arith.mulf %91, %95 : vector<8x128xf32>
    %c3 = arith.constant 3 : index
    %c0_30 = arith.constant 0 : index
    %c0_31 = arith.constant 0 : index
    %97 = vector.load %arg4[%c3, %c0_30, %c0_31] : memref<8x8x128xf32, #tpu.memory_space<vmem>>, vector<1x8x128xf32>
    %98 = vector.shape_cast %97 : vector<1x8x128xf32> to vector<8x128xf32>
    %99 = vector.shape_cast %96 : vector<8x128xf32> to vector<1x8x128xf32>
    tpu.vector_store %arg4[%c3, %c0_30, %c0_31], %99 {strides = array<i32>} : memref<8x8x128xf32, #tpu.memory_space<vmem>>, vector<1x8x128xf32>,
    %100 = vector.extract_strided_slice %5 {offsets = [32, 0], sizes = [8, 512], strides = [1, 1]} : vector<64x512xf32> to vector<8x512xf32>
    %c0_32 = arith.constant 0 : index
    %c0_33 = arith.constant 0 : index
    %101 = vector.load %arg2[%c0_32, %c0_33] : memref<128x512xf32, #tpu.memory_space<vmem>>, vector<128x512xf32>
    %cst_34 = arith.constant dense<0.000000e+00> : vector<8x512xf32>
    %102 = tpu.matmul %96, %101, %cst_34 {dimension_numbers = #tpu.dot_dimension_numbers<[1], [0], [0], [1], [0, 0, 1, 1], [], []>} : vector<8x128xf32>, vector<128x512xf32>, vector<8x512xf32> -> vector<8x512xf32>
    %103 = arith.addf %100, %102 : vector<8x512xf32>
    %104 = vector.extract_strided_slice %103 {offsets = [0, 0], sizes = [8, 384], strides = [1, 1]} : vector<8x512xf32> to vector<8x384xf32>
    %105 = arith.negf %104 : vector<8x384xf32>
    %106 = math.exp %105 : vector<8x384xf32>
    %cst_35 = arith.constant 1.000000e+00 : f32
    %107 = vector.broadcast %cst_35 : f32 to vector<8x384xf32>
    %108 = arith.addf %107, %106 : vector<8x384xf32>
    %109 = arith.divf %107, %108 : vector<8x384xf32>
    %110 = vector.extract_strided_slice %103 {offsets = [0, 384], sizes = [8, 128], strides = [1, 1]} : vector<8x512xf32> to vector<8x128xf32>
    %111 = math.tanh %110 : vector<8x128xf32>
    %112 = vector.extract_strided_slice %109 {offsets = [0, 0], sizes = [8, 128], strides = [1, 1]} : vector<8x384xf32> to vector<8x128xf32>
    %113 = vector.extract_strided_slice %109 {offsets = [0, 128], sizes = [8, 128], strides = [1, 1]} : vector<8x384xf32> to vector<8x128xf32>
    %114 = vector.extract_strided_slice %109 {offsets = [0, 256], sizes = [8, 128], strides = [1, 1]} : vector<8x384xf32> to vector<8x128xf32>
    %115 = arith.mulf %113, %94 : vector<8x128xf32>
    %116 = arith.mulf %112, %111 : vector<8x128xf32>
    %117 = arith.addf %115, %116 : vector<8x128xf32>
    %118 = math.tanh %117 : vector<8x128xf32>
    %119 = arith.mulf %114, %118 : vector<8x128xf32>
    %c4 = arith.constant 4 : index
    %c0_36 = arith.constant 0 : index
    %c0_37 = arith.constant 0 : index
    %120 = vector.load %arg4[%c4, %c0_36, %c0_37] : memref<8x8x128xf32, #tpu.memory_space<vmem>>, vector<1x8x128xf32>
    %121 = vector.shape_cast %120 : vector<1x8x128xf32> to vector<8x128xf32>
    %122 = vector.shape_cast %119 : vector<8x128xf32> to vector<1x8x128xf32>
    tpu.vector_store %arg4[%c4, %c0_36, %c0_37], %122 {strides = array<i32>} : memref<8x8x128xf32, #tpu.memory_space<vmem>>, vector<1x8x128xf32>,
    %123 = vector.extract_strided_slice %5 {offsets = [40, 0], sizes = [8, 512], strides = [1, 1]} : vector<64x512xf32> to vector<8x512xf32>
    %c0_38 = arith.constant 0 : index
    %c0_39 = arith.constant 0 : index
    %124 = vector.load %arg2[%c0_38, %c0_39] : memref<128x512xf32, #tpu.memory_space<vmem>>, vector<128x512xf32>
    %cst_40 = arith.constant dense<0.000000e+00> : vector<8x512xf32>
    %125 = tpu.matmul %119, %124, %cst_40 {dimension_numbers = #tpu.dot_dimension_numbers<[1], [0], [0], [1], [0, 0, 1, 1], [], []>} : vector<8x128xf32>, vector<128x512xf32>, vector<8x512xf32> -> vector<8x512xf32>
    %126 = arith.addf %123, %125 : vector<8x512xf32>
    %127 = vector.extract_strided_slice %126 {offsets = [0, 0], sizes = [8, 384], strides = [1, 1]} : vector<8x512xf32> to vector<8x384xf32>
    %128 = arith.negf %127 : vector<8x384xf32>
    %129 = math.exp %128 : vector<8x384xf32>
    %cst_41 = arith.constant 1.000000e+00 : f32
    %130 = vector.broadcast %cst_41 : f32 to vector<8x384xf32>
    %131 = arith.addf %130, %129 : vector<8x384xf32>
    %132 = arith.divf %130, %131 : vector<8x384xf32>
    %133 = vector.extract_strided_slice %126 {offsets = [0, 384], sizes = [8, 128], strides = [1, 1]} : vector<8x512xf32> to vector<8x128xf32>
    %134 = math.tanh %133 : vector<8x128xf32>
    %135 = vector.extract_strided_slice %132 {offsets = [0, 0], sizes = [8, 128], strides = [1, 1]} : vector<8x384xf32> to vector<8x128xf32>
    %136 = vector.extract_strided_slice %132 {offsets = [0, 128], sizes = [8, 128], strides = [1, 1]} : vector<8x384xf32> to vector<8x128xf32>
    %137 = vector.extract_strided_slice %132 {offsets = [0, 256], sizes = [8, 128], strides = [1, 1]} : vector<8x384xf32> to vector<8x128xf32>
    %138 = arith.mulf %136, %117 : vector<8x128xf32>
    %139 = arith.mulf %135, %134 : vector<8x128xf32>
    %140 = arith.addf %138, %139 : vector<8x128xf32>
    %141 = math.tanh %140 : vector<8x128xf32>
    %142 = arith.mulf %137, %141 : vector<8x128xf32>
    %c5 = arith.constant 5 : index
    %c0_42 = arith.constant 0 : index
    %c0_43 = arith.constant 0 : index
    %143 = vector.load %arg4[%c5, %c0_42, %c0_43] : memref<8x8x128xf32, #tpu.memory_space<vmem>>, vector<1x8x128xf32>
    %144 = vector.shape_cast %143 : vector<1x8x128xf32> to vector<8x128xf32>
    %145 = vector.shape_cast %142 : vector<8x128xf32> to vector<1x8x128xf32>
    tpu.vector_store %arg4[%c5, %c0_42, %c0_43], %145 {strides = array<i32>} : memref<8x8x128xf32, #tpu.memory_space<vmem>>, vector<1x8x128xf32>,
    %146 = vector.extract_strided_slice %5 {offsets = [48, 0], sizes = [8, 512], strides = [1, 1]} : vector<64x512xf32> to vector<8x512xf32>
    %c0_44 = arith.constant 0 : index
    %c0_45 = arith.constant 0 : index
    %147 = vector.load %arg2[%c0_44, %c0_45] : memref<128x512xf32, #tpu.memory_space<vmem>>, vector<128x512xf32>
    %cst_46 = arith.constant dense<0.000000e+00> : vector<8x512xf32>
    %148 = tpu.matmul %142, %147, %cst_46 {dimension_numbers = #tpu.dot_dimension_numbers<[1], [0], [0], [1], [0, 0, 1, 1], [], []>} : vector<8x128xf32>, vector<128x512xf32>, vector<8x512xf32> -> vector<8x512xf32>
    %149 = arith.addf %146, %148 : vector<8x512xf32>
    %150 = vector.extract_strided_slice %149 {offsets = [0, 0], sizes = [8, 384], strides = [1, 1]} : vector<8x512xf32> to vector<8x384xf32>
    %151 = arith.negf %150 : vector<8x384xf32>
    %152 = math.exp %151 : vector<8x384xf32>
    %cst_47 = arith.constant 1.000000e+00 : f32
    %153 = vector.broadcast %cst_47 : f32 to vector<8x384xf32>
    %154 = arith.addf %153, %152 : vector<8x384xf32>
    %155 = arith.divf %153, %154 : vector<8x384xf32>
    %156 = vector.extract_strided_slice %149 {offsets = [0, 384], sizes = [8, 128], strides = [1, 1]} : vector<8x512xf32> to vector<8x128xf32>
    %157 = math.tanh %156 : vector<8x128xf32>
    %158 = vector.extract_strided_slice %155 {offsets = [0, 0], sizes = [8, 128], strides = [1, 1]} : vector<8x384xf32> to vector<8x128xf32>
    %159 = vector.extract_strided_slice %155 {offsets = [0, 128], sizes = [8, 128], strides = [1, 1]} : vector<8x384xf32> to vector<8x128xf32>
    %160 = vector.extract_strided_slice %155 {offsets = [0, 256], sizes = [8, 128], strides = [1, 1]} : vector<8x384xf32> to vector<8x128xf32>
    %161 = arith.mulf %159, %140 : vector<8x128xf32>
    %162 = arith.mulf %158, %157 : vector<8x128xf32>
    %163 = arith.addf %161, %162 : vector<8x128xf32>
    %164 = math.tanh %163 : vector<8x128xf32>
    %165 = arith.mulf %160, %164 : vector<8x128xf32>
    %c6 = arith.constant 6 : index
    %c0_48 = arith.constant 0 : index
    %c0_49 = arith.constant 0 : index
    %166 = vector.load %arg4[%c6, %c0_48, %c0_49] : memref<8x8x128xf32, #tpu.memory_space<vmem>>, vector<1x8x128xf32>
    %167 = vector.shape_cast %166 : vector<1x8x128xf32> to vector<8x128xf32>
    %168 = vector.shape_cast %165 : vector<8x128xf32> to vector<1x8x128xf32>
    tpu.vector_store %arg4[%c6, %c0_48, %c0_49], %168 {strides = array<i32>} : memref<8x8x128xf32, #tpu.memory_space<vmem>>, vector<1x8x128xf32>,
    %169 = vector.extract_strided_slice %5 {offsets = [56, 0], sizes = [8, 512], strides = [1, 1]} : vector<64x512xf32> to vector<8x512xf32>
    %c0_50 = arith.constant 0 : index
    %c0_51 = arith.constant 0 : index
    %170 = vector.load %arg2[%c0_50, %c0_51] : memref<128x512xf32, #tpu.memory_space<vmem>>, vector<128x512xf32>
    %cst_52 = arith.constant dense<0.000000e+00> : vector<8x512xf32>
    %171 = tpu.matmul %165, %170, %cst_52 {dimension_numbers = #tpu.dot_dimension_numbers<[1], [0], [0], [1], [0, 0, 1, 1], [], []>} : vector<8x128xf32>, vector<128x512xf32>, vector<8x512xf32> -> vector<8x512xf32>
    %172 = arith.addf %169, %171 : vector<8x512xf32>
    %173 = vector.extract_strided_slice %172 {offsets = [0, 0], sizes = [8, 384], strides = [1, 1]} : vector<8x512xf32> to vector<8x384xf32>
    %174 = arith.negf %173 : vector<8x384xf32>
    %175 = math.exp %174 : vector<8x384xf32>
    %cst_53 = arith.constant 1.000000e+00 : f32
    %176 = vector.broadcast %cst_53 : f32 to vector<8x384xf32>
    %177 = arith.addf %176, %175 : vector<8x384xf32>
    %178 = arith.divf %176, %177 : vector<8x384xf32>
    %179 = vector.extract_strided_slice %172 {offsets = [0, 384], sizes = [8, 128], strides = [1, 1]} : vector<8x512xf32> to vector<8x128xf32>
    %180 = math.tanh %179 : vector<8x128xf32>
    %181 = vector.extract_strided_slice %178 {offsets = [0, 0], sizes = [8, 128], strides = [1, 1]} : vector<8x384xf32> to vector<8x128xf32>
    %182 = vector.extract_strided_slice %178 {offsets = [0, 128], sizes = [8, 128], strides = [1, 1]} : vector<8x384xf32> to vector<8x128xf32>
    %183 = vector.extract_strided_slice %178 {offsets = [0, 256], sizes = [8, 128], strides = [1, 1]} : vector<8x384xf32> to vector<8x128xf32>
    %184 = arith.mulf %182, %163 : vector<8x128xf32>
    %185 = arith.mulf %181, %180 : vector<8x128xf32>
    %186 = arith.addf %184, %185 : vector<8x128xf32>
    %187 = math.tanh %186 : vector<8x128xf32>
    %188 = arith.mulf %183, %187 : vector<8x128xf32>
    %c7 = arith.constant 7 : index
    %c0_54 = arith.constant 0 : index
    %c0_55 = arith.constant 0 : index
    %189 = vector.load %arg4[%c7, %c0_54, %c0_55] : memref<8x8x128xf32, #tpu.memory_space<vmem>>, vector<1x8x128xf32>
    %190 = vector.shape_cast %189 : vector<1x8x128xf32> to vector<8x128xf32>
    %191 = vector.shape_cast %188 : vector<8x128xf32> to vector<1x8x128xf32>
    tpu.vector_store %arg4[%c7, %c0_54, %c0_55], %191 {strides = array<i32>} : memref<8x8x128xf32, #tpu.memory_space<vmem>>, vector<1x8x128xf32>,
    return
  }
}

</mosaic_0001>

<bundles_post_ra>
// kernel: tpu_custom_call.1
= control target key start
LH: loop header
LB: loop body
LE: loop exit
PB: predicated region body
PF: predicated region fallthrough
CT: control target
= control target key end

     0   :  { %9 = vsyncpa [#allocation3], 0  ;;  %s3489_s0 = inlined_call_operand.hbm [shape: f32[64,128], index: 0, kind: input, shape index: {}]   ;;  %s3490_s1 = inlined_call_operand.hbm [shape: f32[128,512], index: 1, kind: input, shape index: {}]   ;;  %s3491_s2 = inlined_call_operand.hbm [shape: f32[128,512], index: 2, kind: input, shape index: {}]   ;;  %s3492_s3 = inlined_call_operand.hbm [shape: f32[1,512], index: 3, kind: input, shape index: {}]   ;;  %s3493_s4 = inlined_call_operand.hbm [shape: f32[8,8,128], index: 4, kind: output, shape index: {}]  }
   0x1   :  { %10 = vsyncpa [#allocation6], 0 }
   0x2   :  { %11 = vsyncpa [#allocation9], 0  ;;  %s30_s17 = sshll.u32 %s3490_s1, 4  ;;  %s31_s17 = int_to_ptr.hbm [resolvable:$true] %s30_s17 }
   0x3   :  { %12 = vsyncpa [#allocation4], 0  ;;  %s2339_s18 = smov [#allocation5]   ;;  %s17_s22 = sshll.u32 %s3489_s0, 4  ;;  %s18_s22 = int_to_ptr.hbm [resolvable:$true] %s17_s22 }
   0x4   :  { %s32_s19 = sshll.u32 %s2339_s18, 4  ;;  %s2340_s23 = smov 512   ;;  %s33_s19 = int_to_ptr.vmem [resolvable:$true] %s32_s19 }
   0x5   :  { %s2341_s24 = smov 32   ;;  %s2342_s25 = smov [#allocation2]  }
   0x6   :  { %38 = dma.hbm_to_vmem [thread:$0]  %s31_s17, 8192, %s33_s19, [#allocation6], %s2340_s23, %s2340_s23, %s2341_s24  }
   0x7   :  { %s19_s26 = sshll.u32 %s2342_s25, 4  ;;  %s2343_s27 = smov 128   ;;  %s20_s26 = int_to_ptr.vmem [resolvable:$true] %s19_s26 }
   0x8   :  { %s2344_s28 = smov 8   ;;  %s43_s30 = sshll.u32 %s3491_s2, 4  ;;  %s44_s30 = int_to_ptr.hbm [resolvable:$true] %s43_s30 }
   0x9   :  { %25 = dma.hbm_to_vmem [thread:$0]  %s18_s22, 1024, %s20_s26, [#allocation3], %s2343_s27, %s2343_s27, %s2344_s28  }
   0xa   :  { %s2345_s5 = smov [#allocation7]   ;;  %s57_s8 = sshll.u32 %s3492_s3, 4  ;;  %s58_s8 = int_to_ptr.hbm [resolvable:$true] %s57_s8 }
   0xb   :  { %s45_s0 = sshll.u32 %s2345_s5, 4  ;;  %s2346_s9 = smov [#allocation8]   ;;  %s46_s0 = int_to_ptr.vmem [resolvable:$true] %s45_s0 }
   0xc   :  { %51 = dma.hbm_to_vmem [thread:$0]  %s44_s30, 8192, %s46_s0, [#allocation6], %s2340_s23, %s2340_s23, %s2341_s24  }
   0xd   :  { %s59_s10 = sshll.u32 %s2346_s9, 4  ;;  %s60_s10 = int_to_ptr.vmem [resolvable:$true] %s59_s10 }
   0xe   :  { %62 = dma.hbm_to_vmem [thread:$0]  %s58_s8, 64, %s60_s10, [#allocation9]  }
   0xf   :  { %2331 = dma.done.wait [#allocation3], 1024  }
  0x10   :  { %2332 = vsyncadd [#allocation3], 4294966272 }
  0x11   :  { %2333 = dma.done.wait [#allocation6], 16384  }
  0x12   :  { %2334 = vsyncadd [#allocation6], 4294950912 }
  0x13   :  { %2335 = dma.done.wait [#allocation9], 64  }
  0x14   :  { %2336 = vsyncadd [#allocation9], 4294967232  ;;  %v147_v0 = vld [vmem:[#allocation5 + $0x1e0] sm:$0xff]  ;;  %v148_v1 = vld [vmem:[#allocation5 + $0x1e8] sm:$0xff]  ;;  %s2348_s2 = smov [#allocation10]   ;;  %s2034_s13 = sshll.u32 %s3493_s4, 4  ;;  %s2035_s13 = int_to_ptr.hbm [resolvable:$true] %s2034_s13 }
  0x15   :  { %v149_v2 = vld [vmem:[#allocation5 + $0x1f0] sm:$0xff]  ;;  %161 = vmatpush.msra.mxu0 %v147_v0  ;;  %202 = vmatpush.msra.mxu1 %v148_v1  ;;  %v150_v3 = vld [vmem:[#allocation5 + $0x1f8] sm:$0xff]  ;;  %v143_v4 = vld [vmem:[#allocation5 + $0x1c0] sm:$0xff]  ;;  %s2032_s3 = sshll.u32 %s2348_s2, 4  ;;  %s2033_s3 = int_to_ptr.vmem [resolvable:$true] %s2032_s3 }
  0x16   :  { %v144_v5 = vld [vmem:[#allocation5 + $0x1c8] sm:$0xff]  ;;  %243 = vmatpush.msra.mxu2 %v149_v2  ;;  %284 = vmatpush.msra.mxu3 %v150_v3  ;;  %v145_v6 = vld [vmem:[#allocation5 + $0x1d0] sm:$0xff]  ;;  %v146_v7 = vld [vmem:[#allocation5 + $0x1d8] sm:$0xff] }
  0x17   :  { %v139_v8 = vld [vmem:[#allocation5 + $0x1a0] sm:$0xff]  ;;  %162 = vmatpush.msra.mxu0 %v143_v4  ;;  %203 = vmatpush.msra.mxu1 %v144_v5  ;;  %v140_v9 = vld [vmem:[#allocation5 + $0x1a8] sm:$0xff]  ;;  %v141_v10 = vld [vmem:[#allocation5 + $0x1b0] sm:$0xff] }
  0x18   :  { %v142_v11 = vld [vmem:[#allocation5 + $0x1b8] sm:$0xff]  ;;  %244 = vmatpush.msra.mxu2 %v145_v6  ;;  %285 = vmatpush.msra.mxu3 %v146_v7  ;;  %v135_v12 = vld [vmem:[#allocation5 + $0x180] sm:$0xff]  ;;  %v136_v13 = vld [vmem:[#allocation5 + $0x188] sm:$0xff] }
  0x19   :  { %163 = vmatpush.msra.mxu0 %v139_v8  ;;  %204 = vmatpush.msra.mxu1 %v140_v9  ;;  %v137_v14 = vld [vmem:[#allocation5 + $0x190] sm:$0xff]  ;;  %v138_v15 = vld [vmem:[#allocation5 + $0x198] sm:$0xff]  ;;  %v131_v16 = vld [vmem:[#allocation5 + $0x160] sm:$0xff] }
  0x1a   :  { %245 = vmatpush.msra.mxu2 %v141_v10  ;;  %286 = vmatpush.msra.mxu3 %v142_v11  ;;  %v132_v17 = vld [vmem:[#allocation5 + $0x168] sm:$0xff]  ;;  %v133_v18 = vld [vmem:[#allocation5 + $0x170] sm:$0xff]  ;;  %v134_v19 = vld [vmem:[#allocation5 + $0x178] sm:$0xff] }
  0x1b   :  { %164 = vmatpush.msra.mxu0 %v135_v12  ;;  %205 = vmatpush.msra.mxu1 %v136_v13  ;;  %v127_v20 = vld [vmem:[#allocation5 + $0x140] sm:$0xff]  ;;  %v128_v21 = vld [vmem:[#allocation5 + $0x148] sm:$0xff]  ;;  %v129_v22 = vld [vmem:[#allocation5 + $0x150] sm:$0xff] }
  0x1c   :  { %246 = vmatpush.msra.mxu2 %v137_v14  ;;  %287 = vmatpush.msra.mxu3 %v138_v15  ;;  %v130_v23 = vld [vmem:[#allocation5 + $0x158] sm:$0xff]  ;;  %v123_v24 = vld [vmem:[#allocation5 + $0x120] sm:$0xff]  ;;  %v124_v25 = vld [vmem:[#allocation5 + $0x128] sm:$0xff] }
  0x1d   :  { %165 = vmatpush.msra.mxu0 %v131_v16  ;;  %206 = vmatpush.msra.mxu1 %v132_v17  ;;  %v125_v26 = vld [vmem:[#allocation5 + $0x130] sm:$0xff]  ;;  %v126_v27 = vld [vmem:[#allocation5 + $0x138] sm:$0xff]  ;;  %v119_v28 = vld [vmem:[#allocation5 + $0x100] sm:$0xff] }
  0x1e   :  { %247 = vmatpush.msra.mxu2 %v133_v18  ;;  %288 = vmatpush.msra.mxu3 %v134_v19  ;;  %v120_v29 = vld [vmem:[#allocation5 + $0x108] sm:$0xff]  ;;  %v121_v30 = vld [vmem:[#allocation5 + $0x110] sm:$0xff]  ;;  %v122_v31 = vld [vmem:[#allocation5 + $0x118] sm:$0xff] }
  0x1f   :  { %166 = vmatpush.msra.mxu0 %v127_v20  ;;  %207 = vmatpush.msra.mxu1 %v128_v21  ;;  %v115_v32 = vld [vmem:[#allocation5 + $0xe0] sm:$0xff]  ;;  %v116_v33 = vld [vmem:[#allocation5 + $0xe8] sm:$0xff]  ;;  %v117_v34 = vld [vmem:[#allocation5 + $0xf0] sm:$0xff] }
  0x20   :  { %248 = vmatpush.msra.mxu2 %v129_v22  ;;  %289 = vmatpush.msra.mxu3 %v130_v23  ;;  %v118_v35 = vld [vmem:[#allocation5 + $0xf8] sm:$0xff]  ;;  %v111_v36 = vld [vmem:[#allocation5 + $0xc0] sm:$0xff]  ;;  %v112_v37 = vld [vmem:[#allocation5 + $0xc8] sm:$0xff] }
  0x21   :  { %167 = vmatpush.msra.mxu0 %v123_v24  ;;  %208 = vmatpush.msra.mxu1 %v124_v25  ;;  %v113_v38 = vld [vmem:[#allocation5 + $0xd0] sm:$0xff]  ;;  %v114_v39 = vld [vmem:[#allocation5 + $0xd8] sm:$0xff]  ;;  %v107_v40 = vld [vmem:[#allocation5 + $0xa0] sm:$0xff] }
  0x22   :  { %249 = vmatpush.msra.mxu2 %v125_v26  ;;  %290 = vmatpush.msra.mxu3 %v126_v27  ;;  %v108_v41 = vld [vmem:[#allocation5 + $0xa8] sm:$0xff]  ;;  %v109_v42 = vld [vmem:[#allocation5 + $0xb0] sm:$0xff]  ;;  %v110_v43 = vld [vmem:[#allocation5 + $0xb8] sm:$0xff] }
  0x23   :  { %168 = vmatpush.msra.mxu0 %v119_v28  ;;  %209 = vmatpush.msra.mxu1 %v120_v29  ;;  %v103_v44 = vld [vmem:[#allocation5 + $0x80] sm:$0xff]  ;;  %v104_v45 = vld [vmem:[#allocation5 + $0x88] sm:$0xff]  ;;  %v105_v46 = vld [vmem:[#allocation5 + $0x90] sm:$0xff] }
  0x24   :  { %250 = vmatpush.msra.mxu2 %v121_v30  ;;  %291 = vmatpush.msra.mxu3 %v122_v31  ;;  %v106_v47 = vld [vmem:[#allocation5 + $0x98] sm:$0xff]  ;;  %v99_v48 = vld [vmem:[#allocation5 + $0x60] sm:$0xff]  ;;  %v100_v49 = vld [vmem:[#allocation5 + $0x68] sm:$0xff] }
  0x25   :  { %169 = vmatpush.msra.mxu0 %v115_v32  ;;  %210 = vmatpush.msra.mxu1 %v116_v33  ;;  %v101_v50 = vld [vmem:[#allocation5 + $0x70] sm:$0xff]  ;;  %v102_v51 = vld [vmem:[#allocation5 + $0x78] sm:$0xff]  ;;  %v95_v52 = vld [vmem:[#allocation5 + $0x40] sm:$0xff] }
  0x26   :  { %251 = vmatpush.msra.mxu2 %v117_v34  ;;  %292 = vmatpush.msra.mxu3 %v118_v35  ;;  %v96_v53 = vld [vmem:[#allocation5 + $0x48] sm:$0xff]  ;;  %v97_v54 = vld [vmem:[#allocation5 + $0x50] sm:$0xff]  ;;  %v98_v55 = vld [vmem:[#allocation5 + $0x58] sm:$0xff] }
  0x27   :  { %170 = vmatpush.msra.mxu0 %v111_v36  ;;  %211 = vmatpush.msra.mxu1 %v112_v37  ;;  %v91_v56 = vld [vmem:[#allocation5 + $0x20] sm:$0xff]  ;;  %v92_v57 = vld [vmem:[#allocation5 + $0x28] sm:$0xff]  ;;  %v93_v58 = vld [vmem:[#allocation5 + $0x30] sm:$0xff] }
  0x28   :  { %252 = vmatpush.msra.mxu2 %v113_v38  ;;  %293 = vmatpush.msra.mxu3 %v114_v39  ;;  %v94_v59 = vld [vmem:[#allocation5 + $0x38] sm:$0xff]  ;;  %v87_v60 = vld [vmem:[#allocation5] sm:$0xff]  ;;  %v88_v61 = vld [vmem:[#allocation5 + $0x8] sm:$0xff] }
  0x29   :  { %171 = vmatpush.msra.mxu0 %v107_v40  ;;  %212 = vmatpush.msra.mxu1 %v108_v41  ;;  %v89_v62 = vld [vmem:[#allocation5 + $0x10] sm:$0xff]  ;;  %v90_v63 = vld [vmem:[#allocation5 + $0x18] sm:$0xff]  ;;  %v79_v0 = vld [vmem:[#allocation2] sm:$0xff] }
  0x2a   :  { %253 = vmatpush.msra.mxu2 %v109_v42  ;;  %294 = vmatpush.msra.mxu3 %v110_v43  ;;  %v2389_v1 = vld [vmem:[#allocation7 + $0x1e0] sm:$0xff]  ;;  %v2391_v2 = vld [vmem:[#allocation7 + $0x1e8] sm:$0xff]  ;;  %v2393_v3 = vld [vmem:[#allocation7 + $0x1f0] sm:$0xff] }
  0x2b   :  { %172 = vmatpush.msra.mxu0 %v103_v44  ;;  %213 = vmatpush.msra.mxu1 %v104_v45  ;;  %v2395_v4 = vld [vmem:[#allocation7 + $0x1f8] sm:$0xff]  ;;  %v2397_v5 = vld [vmem:[#allocation7 + $0x1c0] sm:$0xff]  ;;  %v2399_v6 = vld [vmem:[#allocation7 + $0x1c8] sm:$0xff] }
  0x2c   :  { %254 = vmatpush.msra.mxu2 %v105_v46  ;;  %295 = vmatpush.msra.mxu3 %v106_v47  ;;  %v2403_v7 = vld [vmem:[#allocation7 + $0x1d0] sm:$0xff]  ;;  %v2405_v8 = vld [vmem:[#allocation7 + $0x1d8] sm:$0xff]  ;;  %v2408_v9 = vld [vmem:[#allocation7 + $0x1a0] sm:$0xff] }
  0x2d   :  { %173 = vmatpush.msra.mxu0 %v99_v48  ;;  %214 = vmatpush.msra.mxu1 %v100_v49  ;;  %v2410_v10 = vld [vmem:[#allocation7 + $0x1a8] sm:$0xff]  ;;  %v2415_v11 = vld [vmem:[#allocation7 + $0x1b0] sm:$0xff]  ;;  %v2417_v12 = vld [vmem:[#allocation7 + $0x1b8] sm:$0xff] }
  0x2e   :  { %255 = vmatpush.msra.mxu2 %v101_v50  ;;  %296 = vmatpush.msra.mxu3 %v102_v51  ;;  %v80_v13 = vld [vmem:[#allocation2 + $0x8] sm:$0xff]  ;;  %v2423_v14 = vld [vmem:[#allocation7 + $0x180] sm:$0xff]  ;;  %v2429_v16 = vld [vmem:[#allocation7 + $0x190] sm:$0xff] }
  0x2f   :  { %174 = vmatpush.msra.mxu0 %v95_v52  ;;  %215 = vmatpush.msra.mxu1 %v96_v53  ;;  %v2425_v15 = vld [vmem:[#allocation7 + $0x188] sm:$0xff]  ;;  %v2431_v17 = vld [vmem:[#allocation7 + $0x198] sm:$0xff]  ;;  %v2433_v18 = vld [vmem:[#allocation7 + $0x160] sm:$0xff] }
  0x30   :  { %256 = vmatpush.msra.mxu2 %v97_v54  ;;  %297 = vmatpush.msra.mxu3 %v98_v55  ;;  %v2435_v19 = vld [vmem:[#allocation7 + $0x168] sm:$0xff]  ;;  %v2439_v20 = vld [vmem:[#allocation7 + $0x170] sm:$0xff]  ;;  %v2441_v21 = vld [vmem:[#allocation7 + $0x178] sm:$0xff] }
  0x31   :  { %175 = vmatpush.msra.mxu0 %v91_v56  ;;  %216 = vmatpush.msra.mxu1 %v92_v57  ;;  %v2444_v22 = vld [vmem:[#allocation7 + $0x140] sm:$0xff]  ;;  %v2446_v23 = vld [vmem:[#allocation7 + $0x148] sm:$0xff]  ;;  %v2451_v24 = vld [vmem:[#allocation7 + $0x150] sm:$0xff] }
  0x32   :  { %257 = vmatpush.msra.mxu2 %v93_v58  ;;  %298 = vmatpush.msra.mxu3 %v94_v59  ;;  %v2453_v25 = vld [vmem:[#allocation7 + $0x158] sm:$0xff]  ;;  %v81_v26 = vld [vmem:[#allocation2 + $0x10] sm:$0xff]  ;;  %v2459_v27 = vld [vmem:[#allocation7 + $0x120] sm:$0xff] }
  0x33   :  { %176 = vmatpush.msra.mxu0 %v87_v60  ;;  %217 = vmatpush.msra.mxu1 %v88_v61  ;;  %v2461_v28 = vld [vmem:[#allocation7 + $0x128] sm:$0xff]  ;;  %v2465_v29 = vld [vmem:[#allocation7 + $0x130] sm:$0xff]  ;;  %v2467_v30 = vld [vmem:[#allocation7 + $0x138] sm:$0xff] }
  0x34   :  { %258 = vmatpush.msra.mxu2 %v89_v62  ;;  %299 = vmatpush.msra.mxu3 %v90_v63  ;;  %v2469_v31 = vld [vmem:[#allocation7 + $0x100] sm:$0xff]  ;;  %v2471_v32 = vld [vmem:[#allocation7 + $0x108] sm:$0xff]  ;;  %v2475_v33 = vld [vmem:[#allocation7 + $0x110] sm:$0xff] }
  0x35   :  { %177 = vmatmul.f32.vlgmr.msra.gmra.mxu0 %v79_v0  ;;  %218 = vmatmul.f32.vlgmr.msra.gmra.mxu1 %v79_v0  ;;  %v2477_v34 = vld [vmem:[#allocation7 + $0x118] sm:$0xff]  ;;  %v2480_v35 = vld [vmem:[#allocation7 + $0xe0] sm:$0xff]  ;;  %v2482_v36 = vld [vmem:[#allocation7 + $0xe8] sm:$0xff] }
  0x36   :  { %259 = vmatmul.f32.vlgmr.msra.gmra.mxu2 %v79_v0  ;;  %300 = vmatmul.f32.vlgmr.msra.gmra.mxu3 %v79_v0  ;;  %v2487_v37 = vld [vmem:[#allocation7 + $0xf0] sm:$0xff]  ;;  %v2489_v38 = vld [vmem:[#allocation7 + $0xf8] sm:$0xff]  ;;  %v2495_v40 = vld [vmem:[#allocation7 + $0xc0] sm:$0xff] }
  0x37   :  { %389 = vmatpush.msrb.mxu0 %v2389_v1  ;;  %409 = vmatpush.msrb.mxu1 %v2391_v2  ;;  %v82_v39 = vld [vmem:[#allocation2 + $0x18] sm:$0xff]  ;;  %v2497_v41 = vld [vmem:[#allocation7 + $0xc8] sm:$0xff]  ;;  %v2501_v42 = vld [vmem:[#allocation7 + $0xd0] sm:$0xff] }
  0x38   :  { %429 = vmatpush.msrb.mxu2 %v2393_v3  ;;  %449 = vmatpush.msrb.mxu3 %v2395_v4  ;;  %v2503_v43 = vld [vmem:[#allocation7 + $0xd8] sm:$0xff]  ;;  %v2505_v44 = vld [vmem:[#allocation7 + $0xa0] sm:$0xff]  ;;  %v2507_v45 = vld [vmem:[#allocation7 + $0xa8] sm:$0xff] }
  0x39   :  { %390 = vmatpush.msrb.mxu0 %v2397_v5  ;;  %410 = vmatpush.msrb.mxu1 %v2399_v6  ;;  %v2511_v46 = vld [vmem:[#allocation7 + $0xb0] sm:$0xff]  ;;  %v2513_v47 = vld [vmem:[#allocation7 + $0xb8] sm:$0xff]  ;;  %v2516_v48 = vld [vmem:[#allocation7 + $0x80] sm:$0xff] }
  0x3a   :  { %430 = vmatpush.msrb.mxu2 %v2403_v7  ;;  %450 = vmatpush.msrb.mxu3 %v2405_v8  ;;  %v2518_v49 = vld [vmem:[#allocation7 + $0x88] sm:$0xff]  ;;  %v2523_v50 = vld [vmem:[#allocation7 + $0x90] sm:$0xff]  ;;  %v2525_v51 = vld [vmem:[#allocation7 + $0x98] sm:$0xff] }
  0x3b   :  { %391 = vmatpush.msrb.mxu0 %v2408_v9  ;;  %411 = vmatpush.msrb.mxu1 %v2410_v10  ;;  %v83_v52 = vld [vmem:[#allocation2 + $0x20] sm:$0xff]  ;;  %v2533_v54 = vld [vmem:[#allocation7 + $0x68] sm:$0xff]  ;;  %v2537_v55 = vld [vmem:[#allocation7 + $0x70] sm:$0xff] }
  0x3c   :  { %431 = vmatpush.msrb.mxu2 %v2415_v11  ;;  %451 = vmatpush.msrb.mxu3 %v2417_v12  ;;  %v2531_v53 = vld [vmem:[#allocation7 + $0x60] sm:$0xff]  ;;  %v2539_v56 = vld [vmem:[#allocation7 + $0x78] sm:$0xff]  ;;  %v2543_v58 = vld [vmem:[#allocation7 + $0x48] sm:$0xff] }
  0x3d   :  { %180 = vmatmul.f32.gmra.mxu0 %v80_v13  ;;  %221 = vmatmul.f32.gmra.mxu1 %v80_v13  ;;  %v2541_v57 = vld [vmem:[#allocation7 + $0x40] sm:$0xff]  ;;  %3531 = vst [vmem:[#allocation15_spill] sm:$0xff] %v2543_v58  ;;  %v2547_v59 = vld [vmem:[#allocation7 + $0x50] sm:$0xff]  ;;  %v2549_v60 = vld [vmem:[#allocation7 + $0x58] sm:$0xff] }
  0x3e   :  { %262 = vmatmul.f32.gmra.mxu2 %v80_v13  ;;  %303 = vmatmul.f32.gmra.mxu3 %v80_v13  ;;  %v2552_v61 = vld [vmem:[#allocation7 + $0x20] sm:$0xff]  ;;  %v2554_v62 = vld [vmem:[#allocation7 + $0x28] sm:$0xff]  ;;  %v2559_v63 = vld [vmem:[#allocation7 + $0x30] sm:$0xff] }
  0x3f   :  { %392 = vmatpush.msrb.mxu0 %v2423_v14  ;;  %412 = vmatpush.msrb.mxu1 %v2425_v15  ;;  %v2561_v0 = vld [vmem:[#allocation7 + $0x38] sm:$0xff]  ;;  %v84_v13 = vld [vmem:[#allocation2 + $0x28] sm:$0xff] }
  0x40   :  { %432 = vmatpush.msrb.mxu2 %v2429_v16  ;;  %452 = vmatpush.msrb.mxu3 %v2431_v17  ;;  %3532 = vst [vmem:[#allocation16_spill] sm:$0xff] %v2561_v0 }
  0x41   :  { %393 = vmatpush.msrb.mxu0 %v2433_v18  ;;  %413 = vmatpush.msrb.mxu1 %v2435_v19 }
  0x42   :  { %433 = vmatpush.msrb.mxu2 %v2439_v20  ;;  %453 = vmatpush.msrb.mxu3 %v2441_v21 }
  0x43   :  { %394 = vmatpush.msrb.mxu0 %v2444_v22  ;;  %414 = vmatpush.msrb.mxu1 %v2446_v23 }
  0x44   :  { %434 = vmatpush.msrb.mxu2 %v2451_v24  ;;  %454 = vmatpush.msrb.mxu3 %v2453_v25 }
  0x45   :  { %183 = vmatmul.f32.gmra.mxu0 %v81_v26  ;;  %224 = vmatmul.f32.gmra.mxu1 %v81_v26 }
  0x46   :  { %265 = vmatmul.f32.gmra.mxu2 %v81_v26  ;;  %306 = vmatmul.f32.gmra.mxu3 %v81_v26  ;;  %v2567_v26 = vld [vmem:[#allocation7] sm:$0xff] }
  0x47   :  { %395 = vmatpush.msrb.mxu0 %v2459_v27  ;;  %415 = vmatpush.msrb.mxu1 %v2461_v28 }
  0x48   :  { %435 = vmatpush.msrb.mxu2 %v2465_v29  ;;  %455 = vmatpush.msrb.mxu3 %v2467_v30 }
  0x49   :  { %396 = vmatpush.msrb.mxu0 %v2469_v31  ;;  %416 = vmatpush.msrb.mxu1 %v2471_v32 }
  0x4a   :  { %436 = vmatpush.msrb.mxu2 %v2475_v33  ;;  %456 = vmatpush.msrb.mxu3 %v2477_v34 }
  0x4b   :  { %397 = vmatpush.msrb.mxu0 %v2480_v35  ;;  %417 = vmatpush.msrb.mxu1 %v2482_v36 }
  0x4c   :  { %437 = vmatpush.msrb.mxu2 %v2487_v37  ;;  %457 = vmatpush.msrb.mxu3 %v2489_v38 }
  0x4d   :  { %186 = vmatmul.f32.gmra.mxu0 %v82_v39  ;;  %227 = vmatmul.f32.gmra.mxu1 %v82_v39 }
  0x4e   :  { %268 = vmatmul.f32.gmra.mxu2 %v82_v39  ;;  %309 = vmatmul.f32.gmra.mxu3 %v82_v39  ;;  %v2569_v39 = vld [vmem:[#allocation7 + $0x8] sm:$0xff] }
  0x4f   :  { %398 = vmatpush.msrb.mxu0 %v2495_v40  ;;  %418 = vmatpush.msrb.mxu1 %v2497_v41 }
  0x50   :  { %438 = vmatpush.msrb.mxu2 %v2501_v42  ;;  %458 = vmatpush.msrb.mxu3 %v2503_v43 }
  0x51   :  { %399 = vmatpush.msrb.mxu0 %v2505_v44  ;;  %419 = vmatpush.msrb.mxu1 %v2507_v45 }
  0x52   :  { %439 = vmatpush.msrb.mxu2 %v2511_v46  ;;  %459 = vmatpush.msrb.mxu3 %v2513_v47 }
  0x53   :  { %400 = vmatpush.msrb.mxu0 %v2516_v48  ;;  %420 = vmatpush.msrb.mxu1 %v2518_v49 }
  0x54   :  { %440 = vmatpush.msrb.mxu2 %v2523_v50  ;;  %460 = vmatpush.msrb.mxu3 %v2525_v51 }
  0x55   :  { %189 = vmatmul.f32.gmra.mxu0 %v83_v52  ;;  %230 = vmatmul.f32.gmra.mxu1 %v83_v52 }
  0x56   :  { %271 = vmatmul.f32.gmra.mxu2 %v83_v52  ;;  %312 = vmatmul.f32.gmra.mxu3 %v83_v52  ;;  %v2573_v52 = vld [vmem:[#allocation7 + $0x10] sm:$0xff] }
  0x57   :  { %401 = vmatpush.msrb.mxu0 %v2531_v53  ;;  %421 = vmatpush.msrb.mxu1 %v2533_v54 }
  0x58   :  { %441 = vmatpush.msrb.mxu2 %v2537_v55  ;;  %461 = vmatpush.msrb.mxu3 %v2539_v56 }
  0x59   :  { %402 = vmatpush.msrb.mxu0 %v2541_v57  ;;  %422 = vmatpush.msrb.mxu1 %v2543_v58  ;;  %v2575_v58 = vld [vmem:[#allocation7 + $0x18] sm:$0xff] }
  0x5a   :  { %442 = vmatpush.msrb.mxu2 %v2547_v59  ;;  %462 = vmatpush.msrb.mxu3 %v2549_v60 }
  0x5b   :  { %403 = vmatpush.msrb.mxu0 %v2552_v61  ;;  %423 = vmatpush.msrb.mxu1 %v2554_v62 }
  0x5c   :  { %443 = vmatpush.msrb.mxu2 %v2559_v63  ;;  %463 = vmatpush.msrb.mxu3 %v2561_v0  ;;  %v85_v0 = vld [vmem:[#allocation2 + $0x30] sm:$0xff] }
  0x5d   :  { %192 = vmatmul.f32.gmra.mxu0 %v84_v13  ;;  %233 = vmatmul.f32.gmra.mxu1 %v84_v13 }
  0x5e   :  { %274 = vmatmul.f32.gmra.mxu2 %v84_v13  ;;  %315 = vmatmul.f32.gmra.mxu3 %v84_v13  ;;  %v86_v13 = vld [vmem:[#allocation2 + $0x38] sm:$0xff] }
  0x5f   :  { %404 = vmatpush.msrb.mxu0 %v2567_v26  ;;  %424 = vmatpush.msrb.mxu1 %v2569_v39 }
  0x60   :  { %444 = vmatpush.msrb.mxu2 %v2573_v52  ;;  %464 = vmatpush.msrb.mxu3 %v2575_v58 }
  0x61   :  { %601 = vmatpush.msra.mxu0 %v2389_v1  ;;  %621 = vmatpush.msra.mxu1 %v2391_v2 }
  0x62   :  { %641 = vmatpush.msra.mxu2 %v2393_v3  ;;  %661 = vmatpush.msra.mxu3 %v2395_v4 }
  0x63   :  { %602 = vmatpush.msra.mxu0 %v2397_v5  ;;  %622 = vmatpush.msra.mxu1 %v2399_v6 }
  0x64   :  { %642 = vmatpush.msra.mxu2 %v2403_v7  ;;  %662 = vmatpush.msra.mxu3 %v2405_v8 }
  0x65   :  { %195 = vmatmul.f32.gmra.mxu0 %v85_v0  ;;  %236 = vmatmul.f32.gmra.mxu1 %v85_v0 }
  0x66   :  { %277 = vmatmul.f32.gmra.mxu2 %v85_v0  ;;  %318 = vmatmul.f32.gmra.mxu3 %v85_v0  ;;  %v2347_v0 = vmov 0.0  }
  0x67   :  { %603 = vmatpush.msra.mxu0 %v2408_v9  ;;  %623 = vmatpush.msra.mxu1 %v2410_v10 }
  0x68   :  { %643 = vmatpush.msra.mxu2 %v2415_v11  ;;  %663 = vmatpush.msra.mxu3 %v2417_v12 }
  0x69   :  { %604 = vmatpush.msra.mxu0 %v2423_v14  ;;  %624 = vmatpush.msra.mxu1 %v2425_v15 }
  0x6a   :  { %644 = vmatpush.msra.mxu2 %v2429_v16  ;;  %664 = vmatpush.msra.mxu3 %v2431_v17 }
  0x6b   :  { %605 = vmatpush.msra.mxu0 %v2433_v18  ;;  %625 = vmatpush.msra.mxu1 %v2435_v19 }
  0x6c   :  { %645 = vmatpush.msra.mxu2 %v2439_v20  ;;  %665 = vmatpush.msra.mxu3 %v2441_v21 }
  0x6d   :  { %198 = vmatmul.f32.gmra.mxu0 %v86_v13  ;;  %239 = vmatmul.f32.gmra.mxu1 %v86_v13 }
  0x6e   :  { %280 = vmatmul.f32.gmra.mxu2 %v86_v13  ;;  %321 = vmatmul.f32.gmra.mxu3 %v86_v13  ;;  %v3533_v13 = vld [vmem:[#allocation15_spill] sm:$0xff] }
  0x6f   :  { %606 = vmatpush.msra.mxu0 %v2444_v22  ;;  %626 = vmatpush.msra.mxu1 %v2446_v23 }
  0x70   :  { %646 = vmatpush.msra.mxu2 %v2451_v24  ;;  %666 = vmatpush.msra.mxu3 %v2453_v25 }
  0x71   :  { %607 = vmatpush.msra.mxu0 %v2459_v27  ;;  %627 = vmatpush.msra.mxu1 %v2461_v28 }
  0x72   :  { %647 = vmatpush.msra.mxu2 %v2465_v29  ;;  %667 = vmatpush.msra.mxu3 %v2467_v30 }
  0x73   :  { %608 = vmatpush.msra.mxu0 %v2469_v31  ;;  %628 = vmatpush.msra.mxu1 %v2471_v32 }
  0x74   :  { %648 = vmatpush.msra.mxu2 %v2475_v33  ;;  %668 = vmatpush.msra.mxu3 %v2477_v34 }
  0x75   :  { %405 = vmatmul.f32.vlgmr.msrb.gmra.mxu0 %v2347_v0  ;;  %425 = vmatmul.f32.vlgmr.msrb.gmra.mxu1 %v2347_v0 }
  0x76   :  { %445 = vmatmul.f32.vlgmr.msrb.gmra.mxu2 %v2347_v0  ;;  %465 = vmatmul.f32.vlgmr.msrb.gmra.mxu3 %v2347_v0  ;;  %v3534_v0 = vld [vmem:[#allocation16_spill] sm:$0xff] }
  0x77   :  { %609 = vmatpush.msra.mxu0 %v2480_v35  ;;  %629 = vmatpush.msra.mxu1 %v2482_v36 }
  0x78   :  { %649 = vmatpush.msra.mxu2 %v2487_v37  ;;  %669 = vmatpush.msra.mxu3 %v2489_v38 }
  0x79   :  { %610 = vmatpush.msra.mxu0 %v2495_v40  ;;  %630 = vmatpush.msra.mxu1 %v2497_v41 }
  0x7a   :  { %650 = vmatpush.msra.mxu2 %v2501_v42  ;;  %670 = vmatpush.msra.mxu3 %v2503_v43 }
  0x7b   :  { %611 = vmatpush.msra.mxu0 %v2505_v44  ;;  %631 = vmatpush.msra.mxu1 %v2507_v45 }
  0x7c   :  { %651 = vmatpush.msra.mxu2 %v2511_v46  ;;  %671 = vmatpush.msra.mxu3 %v2513_v47 }
  0x7d   :  { %612 = vmatpush.msra.mxu0 %v2516_v48  ;;  %632 = vmatpush.msra.mxu1 %v2518_v49 }
  0x7e   :  { %652 = vmatpush.msra.mxu2 %v2523_v50  ;;  %672 = vmatpush.msra.mxu3 %v2525_v51 }
  0x7f   :  { %613 = vmatpush.msra.mxu0 %v2531_v53  ;;  %633 = vmatpush.msra.mxu1 %v2533_v54 }
  0x80   :  { %653 = vmatpush.msra.mxu2 %v2537_v55  ;;  %673 = vmatpush.msra.mxu3 %v2539_v56 }
  0x81   :  { %614 = vmatpush.msra.mxu0 %v2541_v57  ;;  %634 = vmatpush.msra.mxu1 %v3533_v13 }
  0x82   :  { %654 = vmatpush.msra.mxu2 %v2547_v59  ;;  %674 = vmatpush.msra.mxu3 %v2549_v60 }
  0x83   :  { %615 = vmatpush.msra.mxu0 %v2552_v61  ;;  %635 = vmatpush.msra.mxu1 %v2554_v62 }
  0x84   :  { %655 = vmatpush.msra.mxu2 %v2559_v63  ;;  %675 = vmatpush.msra.mxu3 %v3534_v0 }
  0x85   :  { %616 = vmatpush.msra.mxu0 %v2567_v26  ;;  %636 = vmatpush.msra.mxu1 %v2569_v39 }
  0x86   :  { %656 = vmatpush.msra.mxu2 %v2573_v52  ;;  %676 = vmatpush.msra.mxu3 %v2575_v58 }
  0x87   :  { %814 = vmatpush.msrb.mxu0 %v2389_v1  ;;  %834 = vmatpush.msrb.mxu1 %v2391_v2 }
  0x88   :  { %854 = vmatpush.msrb.mxu2 %v2393_v3  ;;  %874 = vmatpush.msrb.mxu3 %v2395_v4  ;;  %v151_v3 = vld [vmem:[#allocation8] sm:$0xf] }
  0x89   :  { %815 = vmatpush.msrb.mxu0 %v2397_v5  ;;  %835 = vmatpush.msrb.mxu1 %v2399_v6  ;;  %v153_v4 = vperm.slane %v151_v3, 0  ;;  %v154_v5 = vperm.slane %v151_v3, 1 }
  0x8a   :  { %855 = vmatpush.msrb.mxu2 %v2403_v7  ;;  %875 = vmatpush.msrb.mxu3 %v2405_v8 }
  0x8b   :  { %816 = vmatpush.msrb.mxu0 %v2408_v9  ;;  %836 = vmatpush.msrb.mxu1 %v2410_v10 }
  0x8c   :  { %856 = vmatpush.msrb.mxu2 %v2415_v11  ;;  %876 = vmatpush.msrb.mxu3 %v2417_v12  ;;  %v2717_v12 = vperm.slane %v151_v3, 2 }
  0x8d   :  { %817 = vmatpush.msrb.mxu0 %v2423_v14  ;;  %837 = vmatpush.msrb.mxu1 %v2425_v15  ;;  %v2719_v14 = vperm.slane %v151_v3, 3 }
  0x8e   :  { %857 = vmatpush.msrb.mxu2 %v2429_v16  ;;  %877 = vmatpush.msrb.mxu3 %v2431_v17 }
  0x8f   :  { %818 = vmatpush.msrb.mxu0 %v2433_v18  ;;  %838 = vmatpush.msrb.mxu1 %v2435_v19 }
  0x90   :  { %858 = vmatpush.msrb.mxu2 %v2439_v20  ;;  %878 = vmatpush.msrb.mxu3 %v2441_v21 }
  0x91   :  { %819 = vmatpush.msrb.mxu0 %v2444_v22  ;;  %839 = vmatpush.msrb.mxu1 %v2446_v23 }
  0x92   :  { %859 = vmatpush.msrb.mxu2 %v2451_v24  ;;  %879 = vmatpush.msrb.mxu3 %v2453_v25 }
  0x93   :  { %820 = vmatpush.msrb.mxu0 %v2459_v27  ;;  %840 = vmatpush.msrb.mxu1 %v2461_v28 }
  0x94   :  { %860 = vmatpush.msrb.mxu2 %v2465_v29  ;;  %880 = vmatpush.msrb.mxu3 %v2467_v30 }
  0x95   :  { %821 = vmatpush.msrb.mxu0 %v2469_v31  ;;  %841 = vmatpush.msrb.mxu1 %v2471_v32 }
  0x96   :  { %861 = vmatpush.msrb.mxu2 %v2475_v33  ;;  %881 = vmatpush.msrb.mxu3 %v2477_v34 }
  0x97   :  { %822 = vmatpush.msrb.mxu0 %v2480_v35  ;;  %842 = vmatpush.msrb.mxu1 %v2482_v36 }
  0x98   :  { %862 = vmatpush.msrb.mxu2 %v2487_v37  ;;  %882 = vmatpush.msrb.mxu3 %v2489_v38 }
  0x99   :  { %823 = vmatpush.msrb.mxu0 %v2495_v40  ;;  %843 = vmatpush.msrb.mxu1 %v2497_v41 }
  0x9a   :  { %863 = vmatpush.msrb.mxu2 %v2501_v42  ;;  %883 = vmatpush.msrb.mxu3 %v2503_v43 }
  0x9b   :  { %824 = vmatpush.msrb.mxu0 %v2505_v44  ;;  %844 = vmatpush.msrb.mxu1 %v2507_v45 }
  0x9c   :  { %864 = vmatpush.msrb.mxu2 %v2511_v46  ;;  %884 = vmatpush.msrb.mxu3 %v2513_v47 }
  0x9d   :  { %825 = vmatpush.msrb.mxu0 %v2516_v48  ;;  %845 = vmatpush.msrb.mxu1 %v2518_v49 }
  0x9e   :  { %865 = vmatpush.msrb.mxu2 %v2523_v50  ;;  %885 = vmatpush.msrb.mxu3 %v2525_v51 }
  0x9f   :  { %826 = vmatpush.msrb.mxu0 %v2531_v53  ;;  %846 = vmatpush.msrb.mxu1 %v2533_v54 }
  0xa0   :  { %866 = vmatpush.msrb.mxu2 %v2537_v55  ;;  %886 = vmatpush.msrb.mxu3 %v2539_v56 }
  0xa1   :  { %827 = vmatpush.msrb.mxu0 %v2541_v57  ;;  %847 = vmatpush.msrb.mxu1 %v3533_v13 }
  0xa2   :  { %867 = vmatpush.msrb.mxu2 %v2547_v59  ;;  %887 = vmatpush.msrb.mxu3 %v2549_v60 }
  0xa3   :  { %828 = vmatpush.msrb.mxu0 %v2552_v61  ;;  %848 = vmatpush.msrb.mxu1 %v2554_v62 }
  0xa4   :  { %868 = vmatpush.msrb.mxu2 %v2559_v63  ;;  %888 = vmatpush.msrb.mxu3 %v3534_v0 }
  0xa5   :  { %829 = vmatpush.msrb.mxu0 %v2567_v26  ;;  %849 = vmatpush.msrb.mxu1 %v2569_v39 }
  0xa6   :  { %869 = vmatpush.msrb.mxu2 %v2573_v52  ;;  %889 = vmatpush.msrb.mxu3 %v2575_v58 }
  0xb2   :  { %v178_v1 = vpop.f32.mrf.mxu0  ;;  %v219_v2 = vpop.f32.mrf.mxu1 }
  0xb3   :  { %v179_v52 = vadd.f32 %v178_v1, %v153_v4  ;;  %v220_v13 = vadd.f32 %v219_v2, %v154_v5 }
  0xb9   :  { %v2709_v6 = vpop.f32.mrf.mxu2  ;;  %v2711_v7 = vpop.f32.mrf.mxu3 }
  0xba   :  { %v181_v8 = vpop.f32.mrf.mxu0  ;;  %v222_v9 = vpop.f32.mrf.mxu1 }
  0xbb   :  { %v2713_v10 = vadd.f32 %v181_v8, %v153_v4  ;;  %v2715_v11 = vadd.f32 %v222_v9, %v154_v5 }
  0xc1   :  { %v263_v15 = vpop.f32.mrf.mxu2  ;;  %v304_v16 = vpop.f32.mrf.mxu3 }
  0xc2   :  { %v2722_v17 = vadd.f32 %v263_v15, %v2717_v12  ;;  %v2725_v18 = vadd.f32 %v304_v16, %v2719_v14  ;;  %v184_v19 = vpop.f32.mrf.mxu0  ;;  %v225_v20 = vpop.f32.mrf.mxu1 }
  0xc3   :  { %v2727_v21 = vadd.f32 %v184_v19, %v153_v4  ;;  %v2729_v22 = vadd.f32 %v225_v20, %v154_v5 }
  0xc9   :  { %v266_v23 = vpop.f32.mrf.mxu2  ;;  %v307_v24 = vpop.f32.mrf.mxu3 }
  0xca   :  { %v2732_v25 = vadd.f32 %v266_v23, %v2717_v12  ;;  %v2735_v27 = vadd.f32 %v307_v24, %v2719_v14  ;;  %v187_v28 = vpop.f32.mrf.mxu0  ;;  %v228_v29 = vpop.f32.mrf.mxu1 }
  0xcb   :  { %v2737_v30 = vadd.f32 %v187_v28, %v153_v4  ;;  %v2739_v31 = vadd.f32 %v228_v29, %v154_v5  ;;  %v261_v28 = vadd.f32 %v2709_v6, %v2717_v12 }
  0xcd   :  { %3535 = vst [vmem:[#allocation15_spill] sm:$0xff] %v2737_v30  ;;  %v2975_v30 = vld [vmem:[#allocation7 + $0x30] sm:$0xff] }
  0xce   :  { %3536 = vst [vmem:[#allocation16_spill] sm:$0xff] %v2739_v31  ;;  %v2971_v31 = vld [vmem:[#allocation7 + $0x28] sm:$0xff] }
  0xd1   :  { %v269_v32 = vpop.f32.mrf.mxu2  ;;  %v310_v33 = vpop.f32.mrf.mxu3 }
  0xd2   :  { %v2742_v34 = vadd.f32 %v269_v32, %v2717_v12  ;;  %v2745_v35 = vadd.f32 %v310_v33, %v2719_v14  ;;  %v190_v36 = vpop.f32.mrf.mxu0  ;;  %v231_v37 = vpop.f32.mrf.mxu1 }
  0xd3   :  { %v2747_v38 = vadd.f32 %v190_v36, %v153_v4  ;;  %v2749_v40 = vadd.f32 %v231_v37, %v154_v5 }
  0xd4   :  { %3537 = vst [vmem:[#allocation17_spill] sm:$0xff] %v2742_v34  ;;  %v2969_v34 = vld [vmem:[#allocation7 + $0x20] sm:$0xff] }
  0xd5   :  { %3538 = vst [vmem:[#allocation18_spill] sm:$0xff] %v2745_v35 }
  0xd6   :  { %3539 = vst [vmem:[#allocation19_spill] sm:$0xff] %v2747_v38  ;;  %v2962_v38 = vld [vmem:[#allocation7 + $0x50] sm:$0xff] }
  0xd7   :  { %3540 = vst [vmem:[#allocation20_spill] sm:$0xff] %v2749_v40  ;;  %v2960_v40 = vld [vmem:[#allocation7 + $0x48] sm:$0xff] }
  0xd8   :  { %3574 = vst [vmem:[#allocation54_spill] sm:$0xff] %v2960_v40 }
  0xd9   :  { %v272_v41 = vpop.f32.mrf.mxu2  ;;  %v313_v42 = vpop.f32.mrf.mxu3 }
  0xda   :  { %v2752_v43 = vadd.f32 %v272_v41, %v2717_v12  ;;  %v2755_v44 = vadd.f32 %v313_v42, %v2719_v14  ;;  %v193_v45 = vpop.f32.mrf.mxu0  ;;  %v234_v46 = vpop.f32.mrf.mxu1  ;;  %v302_v41 = vadd.f32 %v2711_v7, %v2719_v14 }
  0xdb   :  { %v2757_v47 = vadd.f32 %v193_v45, %v153_v4  ;;  %v2759_v48 = vadd.f32 %v234_v46, %v154_v5 }
  0xdc   :  { %3541 = vst [vmem:[#allocation21_spill] sm:$0xff] %v2752_v43 }
  0xdd   :  { %3542 = vst [vmem:[#allocation22_spill] sm:$0xff] %v2755_v44  ;;  %v2954_v44 = vld [vmem:[#allocation7 + $0x78] sm:$0xff] }
  0xde   :  { %3543 = vst [vmem:[#allocation23_spill] sm:$0xff] %v2757_v47  ;;  %v2952_v47 = vld [vmem:[#allocation7 + $0x70] sm:$0xff] }
  0xdf   :  { %3544 = vst [vmem:[#allocation24_spill] sm:$0xff] %v2759_v48  ;;  %v2948_v48 = vld [vmem:[#allocation7 + $0x68] sm:$0xff] }
  0xe0   :  { %3570 = vst [vmem:[#allocation50_spill] sm:$0xff] %v2948_v48 }
  0xe1   :  { %v275_v49 = vpop.f32.mrf.mxu2  ;;  %v316_v50 = vpop.f32.mrf.mxu3  ;;  %3571 = vst [vmem:[#allocation51_spill] sm:$0xff] %v2952_v47 }
  0xe2   :  { %v2762_v51 = vadd.f32 %v275_v49, %v2717_v12  ;;  %v2765_v53 = vadd.f32 %v316_v50, %v2719_v14  ;;  %v196_v54 = vpop.f32.mrf.mxu0  ;;  %v237_v55 = vpop.f32.mrf.mxu1  ;;  %3572 = vst [vmem:[#allocation52_spill] sm:$0xff] %v2954_v44 }
  0xe3   :  { %v2767_v56 = vadd.f32 %v196_v54, %v153_v4  ;;  %v2769_v57 = vadd.f32 %v237_v55, %v154_v5 }
  0xe4   :  { %3545 = vst [vmem:[#allocation25_spill] sm:$0xff] %v2762_v51  ;;  %v2940_v51 = vld [vmem:[#allocation7 + $0x90] sm:$0xff] }
  0xe5   :  { %3546 = vst [vmem:[#allocation26_spill] sm:$0xff] %v2765_v53 }
  0xe6   :  { %3547 = vst [vmem:[#allocation27_spill] sm:$0xff] %v2767_v56  ;;  %v2928_v56 = vld [vmem:[#allocation7 + $0xb0] sm:$0xff] }
  0xe7   :  { %3548 = vst [vmem:[#allocation28_spill] sm:$0xff] %v2769_v57  ;;  %v2926_v57 = vld [vmem:[#allocation7 + $0xa8] sm:$0xff] }
  0xe9   :  { %v278_v58 = vpop.f32.mrf.mxu2  ;;  %v319_v59 = vpop.f32.mrf.mxu3 }
  0xea   :  { %v2772_v60 = vadd.f32 %v278_v58, %v2717_v12  ;;  %v2775_v61 = vadd.f32 %v319_v59, %v2719_v14  ;;  %v199_v62 = vpop.f32.mrf.mxu0  ;;  %v240_v63 = vpop.f32.mrf.mxu1 }
  0xeb   :  { %v2777_v26 = vadd.f32 %v199_v62, %v153_v4  ;;  %v2779_v39 = vadd.f32 %v240_v63, %v154_v5 }
  0xec   :  { %3549 = vst [vmem:[#allocation29_spill] sm:$0xff] %v2772_v60  ;;  %v2924_v60 = vld [vmem:[#allocation7 + $0xa0] sm:$0xff] }
  0xed   :  { %3550 = vst [vmem:[#allocation30_spill] sm:$0xff] %v2775_v61  ;;  %v2920_v61 = vld [vmem:[#allocation7 + $0xd8] sm:$0xff] }
  0xee   :  { %3551 = vst [vmem:[#allocation31_spill] sm:$0xff] %v2777_v26 }
  0xef   :  { %3552 = vst [vmem:[#allocation32_spill] sm:$0xff] %v2779_v39 }
  0xf1   :  { %v281_v0 = vpop.f32.mrf.mxu2  ;;  %v322_v3 = vpop.f32.mrf.mxu3 }
  0xf2   :  { %v2782_v8 = vadd.f32 %v281_v0, %v2717_v12  ;;  %v2785_v9 = vadd.f32 %v322_v3, %v2719_v14  ;;  %v406_v15 = vpop.f32.mrf.mxu0  ;;  %v426_v16 = vpop.f32.mrf.mxu1 }
  0xf3   :  { %v469_v19 = vadd.f32 %v406_v15, %v179_v52  ;;  %v470_v20 = vadd.f32 %v426_v16, %v220_v13 }
  0xf4   :  { %3553 = vst [vmem:[#allocation33_spill] sm:$0xff] %v2782_v8  ;;  %v2914_v8 = vld [vmem:[#allocation7 + $0xd0] sm:$0xff] }
  0xf5   :  { %3554 = vst [vmem:[#allocation34_spill] sm:$0xff] %v2785_v9  ;;  %v2049_v23 = vmul.f32 -1.442695, %v469_v19  ;;  %v2050_v24 = vmul.f32 -1.442695, %v470_v20  ;;  %v2912_v9 = vld [vmem:[#allocation7 + $0xc8] sm:$0xff] }
  0xf7   :  { %2083 = vpow2.f32 %v2049_v23 }
  0xf8   :  { %2085 = vpow2.f32 %v2050_v24 }
  0xf9   :  { %v446_v1 = vpop.f32.mrf.mxu2  ;;  %v466_v36 = vpop.f32.mrf.mxu3 }
  0xfa   :  { %v471_v2 = vadd.f32 %v446_v1, %v261_v28  ;;  %v472_v46 = vadd.f32 %v466_v36, %v302_v41 }
  0xfc   :  { %v2051_v4 = vmul.f32 -1.442695, %v471_v2 }
  0xfd   :  { %v2084_v5 = vpop.eup %2083 }
  0xfe   :  { %v2086_v29 = vpop.eup %2085  ;;  %v482_v32 = vadd.f32 1.0, %v2084_v5  ;;  %2087 = vpow2.f32 %v2051_v4 }
  0xff   :  { %v483_v33 = vadd.f32 1.0, %v2086_v29 }
 0x100   :  { %2089 = vrcp.f32 %v482_v32  ;;  %v496_v55 = vand.u32 2147483648, %v482_v32  ;;  %v494_v62 = vand.u32 2147483647, %v482_v32  ;;  %vm490_vm2 = vweird.f32 %v482_v32 }
 0x101   :  { %2091 = vrcp.f32 %v483_v33  ;;  %v511_v58 = vand.u32 2147483648, %v483_v33  ;;  %v509_v52 = vand.u32 2147483647, %v483_v33  ;;  %vm505_vm3 = vweird.f32 %v483_v33 }
 0x102   :  { %v497_v0 = vor.u32 1.1754944e-38, %v496_v55  ;;  %vm495_vm5 = vcmp.eq.f32.partialorder %v494_v62, 8.507059e+37 }
 0x103   :  { %v512_v15 = vor.u32 1.1754944e-38, %v511_v58  ;;  %vm510_vm7 = vcmp.eq.f32.partialorder %v509_v52, 8.507059e+37 }
 0x104   :  { %v2088_v37 = vpop.eup %2087 }
 0x105   :  { %v484_v42 = vadd.f32 1.0, %v2088_v37 }
 0x106   :  { %v2090_v45 = vpop.eup %2089 }
 0x107   :  { %v2092_v6 = vpop.eup %2091  ;;  %v486_v12 = vmul.f32 %v2090_v45, %v482_v32  ;;  %2093 = vrcp.f32 %v484_v42  ;;  %vm491_vm0 = vweird.f32 %v2090_v45  ;;  %v526_v32 = vand.u32 2147483648, %v484_v42 }
 0x108   :  { %v501_v49 = vmul.f32 %v2092_v6, %v483_v33  ;;  %2095 = vtanh.f32 %v472_v46  ;;  %vm506_vm1 = vweird.f32 %v2092_v6  ;;  %vm492_vm4 = vmor %vm490_vm2, %vm491_vm0  ;;  %vm520_vm9 = vweird.f32 %v484_v42 }
 0x109   :  { %v487_v50 = vsub.f32 1.0, %v486_v12  ;;  %vm507_vm6 = vmor %vm505_vm3, %vm506_vm1  ;;  %v524_v33 = vand.u32 2147483647, %v484_v42  ;;  %v527_v37 = vor.u32 1.1754944e-38, %v526_v32 }
 0x10a   :  { %v502_v54 = vsub.f32 1.0, %v501_v49 }
 0x10b   :  { %v488_v59 = vmul.f32 %v2090_v45, %v487_v50  ;;  %vm525_vm11 = vcmp.eq.f32.partialorder %v524_v33, 8.507059e+37 }
 0x10c   :  { %v503_v63 = vmul.f32 %v2092_v6, %v502_v54 }
 0x10d   :  { %v2094_v13 = vpop.eup %2093  ;;  %v489_v7 = vadd.f32 %v2090_v45, %v488_v59 }
 0x10e   :  { %v516_v14 = vmul.f32 %v2094_v13, %v484_v42  ;;  %v504_v3 = vadd.f32 %v2092_v6, %v503_v63  ;;  %v2096_v19 = vpop.eup %2095  ;;  %vm521_vm8 = vweird.f32 %v2094_v13 }
 0x10f   :  { %v493_v16 = vsel %vm492_vm4, %v2090_v45, %v489_v7  ;;  %vm522_vm10 = vmor %vm520_vm9, %vm521_vm8 }
 0x110   :  { %v517_v20 = vsub.f32 1.0, %v516_v14  ;;  %v498_v23 = vsel %vm495_vm5, %v497_v0, %v493_v16  ;;  %v508_v24 = vsel %vm507_vm6, %v2092_v6, %v504_v3 }
 0x111   :  { %v513_v28 = vsel %vm510_vm7, %v512_v15, %v508_v24  ;;  %v532_v1 = vmul.f32 %v2096_v19, %v498_v23 }
 0x112   :  { %v518_v2 = vmul.f32 %v2094_v13, %v517_v20  ;;  %v531_v4 = vmul.f32 0.0, %v513_v28 }
 0x114   :  { %v2791_v5 = vadd.f32 %v532_v1, %v531_v4  ;;  %v519_v29 = vadd.f32 %v2094_v13, %v518_v2 }
 0x116   :  { %2097 = vtanh.f32 %v2791_v5  ;;  %v523_v36 = vsel %vm522_vm10, %v2094_v13, %v519_v29 }
 0x117   :  { %v528_v45 = vsel %vm525_vm11, %v527_v37, %v523_v36 }
 0x11c   :  { %v2098_v41 = vpop.eup %2097 }
 0x11d   :  { %v535_v46 = vmul.f32 %v2098_v41, %v528_v45 }
 0x11f   :  { %536 = vst [vmem:[#allocation10] sm:$0xff] %v535_v46  ;;  %617 = vmatmul.f32.vlgmr.msra.gmra.mxu0 %v535_v46  ;;  %637 = vmatmul.f32.vlgmr.msra.gmra.mxu1 %v535_v46 }
 0x120   :  { %657 = vmatmul.f32.vlgmr.msra.gmra.mxu2 %v535_v46  ;;  %677 = vmatmul.f32.vlgmr.msra.gmra.mxu3 %v535_v46 }
 0x19c   :  { %v618_v6 = vpop.f32.mrf.mxu0  ;;  %v638_v12 = vpop.f32.mrf.mxu1 }
 0x19d   :  { %v681_v49 = vadd.f32 %v618_v6, %v2713_v10  ;;  %v682_v50 = vadd.f32 %v638_v12, %v2715_v11 }
 0x19f   :  { %v2052_v54 = vmul.f32 -1.442695, %v681_v49  ;;  %v2053_v42 = vmul.f32 -1.442695, %v682_v50 }
 0x1a1   :  { %2099 = vpow2.f32 %v2052_v54 }
 0x1a2   :  { %2101 = vpow2.f32 %v2053_v42 }
 0x1a3   :  { %v658_v55 = vpop.f32.mrf.mxu2  ;;  %v678_v7 = vpop.f32.mrf.mxu3 }
 0x1a4   :  { %v683_v58 = vadd.f32 %v658_v55, %v2722_v17  ;;  %v684_v11 = vadd.f32 %v678_v7, %v2725_v18 }
 0x1a6   :  { %v2054_v59 = vmul.f32 -1.442695, %v683_v58 }
 0x1a7   :  { %v2100_v62 = vpop.eup %2099 }
 0x1a8   :  { %v2102_v63 = vpop.eup %2101  ;;  %v694_v52 = vadd.f32 1.0, %v2100_v62  ;;  %2103 = vpow2.f32 %v2054_v59 }
 0x1a9   :  { %v695_v13 = vadd.f32 1.0, %v2102_v63 }
 0x1aa   :  { %2105 = vrcp.f32 %v694_v52  ;;  %v708_v20 = vand.u32 2147483648, %v694_v52  ;;  %v706_v28 = vand.u32 2147483647, %v694_v52  ;;  %vm702_vm14 = vweird.f32 %v694_v52 }
 0x1ab   :  { %2107 = vrcp.f32 %v695_v13  ;;  %v723_v23 = vand.u32 2147483648, %v695_v13  ;;  %v721_v2 = vand.u32 2147483647, %v695_v13  ;;  %vm717_vm15 = vweird.f32 %v695_v13 }
 0x1ac   :  { %v709_v32 = vor.u32 1.1754944e-38, %v708_v20  ;;  %vm707_vm2 = vcmp.eq.f32.partialorder %v706_v28, 8.507059e+37  ;;  %v2830_v20 = vld [vmem:[#allocation7 + $0x1b0] sm:$0xff]  ;;  %v2840_v28 = vld [vmem:[#allocation7 + $0x188] sm:$0xff] }
 0x1ad   :  { %v724_v36 = vor.u32 1.1754944e-38, %v723_v23  ;;  %vm722_vm3 = vcmp.eq.f32.partialorder %v721_v2, 8.507059e+37  ;;  %v2834_v23 = vld [vmem:[#allocation7 + $0x1b8] sm:$0xff]  ;;  %3561 = vst [vmem:[#allocation41_spill] sm:$0xff] %v2840_v28 }
 0x1ae   :  { %v2104_v14 = vpop.eup %2103  ;;  %3559 = vst [vmem:[#allocation39_spill] sm:$0xff] %v2834_v23  ;;  %v2846_v2 = vld [vmem:[#allocation7 + $0x198] sm:$0xff] }
 0x1af   :  { %v696_v10 = vadd.f32 1.0, %v2104_v14  ;;  %v2804_v14 = vld [vmem:[#allocation7 + $0x1e8] sm:$0xff] }
 0x1b0   :  { %v2106_v0 = vpop.eup %2105  ;;  %3555 = vst [vmem:[#allocation35_spill] sm:$0xff] %v2804_v14  ;;  %1047 = vmatpush.msra.mxu1 %v2804_v14 }
 0x1b1   :  { %v2108_v3 = vpop.eup %2107  ;;  %v698_v15 = vmul.f32 %v2106_v0, %v694_v52  ;;  %2109 = vrcp.f32 %v696_v10  ;;  %vm703_vm12 = vweird.f32 %v2106_v0  ;;  %v738_v58 = vand.u32 2147483648, %v696_v10 }
 0x1b2   :  { %v713_v16 = vmul.f32 %v2108_v3, %v695_v13  ;;  %2111 = vtanh.f32 %v684_v11  ;;  %vm718_vm13 = vweird.f32 %v2108_v3  ;;  %vm704_vm0 = vmor %vm702_vm14, %vm703_vm12  ;;  %vm732_vm5 = vweird.f32 %v696_v10  ;;  %v2814_v11 = vld [vmem:[#allocation7 + $0x1c0] sm:$0xff] }
 0x1b3   :  { %v699_v19 = vsub.f32 1.0, %v698_v15  ;;  %vm719_vm1 = vmor %vm717_vm15, %vm718_vm13  ;;  %v736_v59 = vand.u32 2147483647, %v696_v10  ;;  %v739_v63 = vor.u32 1.1754944e-38, %v738_v58  ;;  %3557 = vst [vmem:[#allocation37_spill] sm:$0xff] %v2814_v11  ;;  %v2818_v15 = vld [vmem:[#allocation7 + $0x1d0] sm:$0xff] }
 0x1b4   :  { %v714_v17 = vsub.f32 1.0, %v713_v16  ;;  %v2822_v16 = vld [vmem:[#allocation7 + $0x1d8] sm:$0xff]  ;;  %v2898_v58 = vld [vmem:[#allocation7 + $0xe0] sm:$0xff] }
 0x1b5   :  { %v700_v24 = vmul.f32 %v2106_v0, %v699_v19  ;;  %vm737_vm7 = vcmp.eq.f32.partialorder %v736_v59, 8.507059e+37  ;;  %v2826_v19 = vld [vmem:[#allocation7 + $0x1a0] sm:$0xff]  ;;  %v2900_v59 = vld [vmem:[#allocation7 + $0xe8] sm:$0xff] }
 0x1b6   :  { %v715_v1 = vmul.f32 %v2108_v3, %v714_v17  ;;  %v2828_v17 = vld [vmem:[#allocation7 + $0x1a8] sm:$0xff] }
 0x1b7   :  { %v2110_v4 = vpop.eup %2109  ;;  %v701_v29 = vadd.f32 %v2106_v0, %v700_v24  ;;  %v2838_v24 = vld [vmem:[#allocation7 + $0x180] sm:$0xff] }
 0x1b8   :  { %v728_v18 = vmul.f32 %v2110_v4, %v696_v10  ;;  %v716_v33 = vadd.f32 %v2108_v3, %v715_v1  ;;  %v2112_v41 = vpop.eup %2111  ;;  %vm733_vm4 = vweird.f32 %v2110_v4  ;;  %v2810_v10 = vld [vmem:[#allocation7 + $0x1f8] sm:$0xff]  ;;  %3560 = vst [vmem:[#allocation40_spill] sm:$0xff] %v2838_v24  ;;  %v2842_v1 = vld [vmem:[#allocation7 + $0x190] sm:$0xff] }
 0x1b9   :  { %v705_v37 = vsel %vm704_vm0, %v2106_v0, %v701_v29  ;;  %vm734_vm6 = vmor %vm732_vm5, %vm733_vm4  ;;  %v2806_v0 = vld [vmem:[#allocation7 + $0x1f0] sm:$0xff]  ;;  %1087 = vmatpush.msra.mxu3 %v2810_v10  ;;  %3562 = vst [vmem:[#allocation42_spill] sm:$0xff] %v2842_v1  ;;  %v2852_v29 = vld [vmem:[#allocation7 + $0x168] sm:$0xff] }
 0x1ba   :  { %v729_v45 = vsub.f32 1.0, %v728_v18  ;;  %v710_v46 = vsel %vm707_vm2, %v709_v32, %v705_v37  ;;  %v720_v6 = vsel %vm719_vm1, %v2108_v3, %v716_v33  ;;  %3556 = vst [vmem:[#allocation36_spill] sm:$0xff] %v2806_v0  ;;  %1067 = vmatpush.msra.mxu2 %v2806_v0  ;;  %v2816_v3 = vld [vmem:[#allocation7 + $0x1c8] sm:$0xff]  ;;  %v2854_v18 = vld [vmem:[#allocation7 + $0x170] sm:$0xff]  ;;  %v2858_v32 = vld [vmem:[#allocation7 + $0x178] sm:$0xff] }
 0x1bb   :  { %v725_v12 = vsel %vm722_vm3, %v724_v36, %v720_v6  ;;  %v744_v49 = vmul.f32 %v2112_v41, %v710_v46  ;;  %3558 = vst [vmem:[#allocation38_spill] sm:$0xff] %v2816_v3  ;;  %1048 = vmatpush.msra.mxu1 %v2816_v3  ;;  %1088 = vmatpush.msra.mxu3 %v2822_v16  ;;  %v2862_v33 = vld [vmem:[#allocation7 + $0x140] sm:$0xff]  ;;  %v2864_v36 = vld [vmem:[#allocation7 + $0x148] sm:$0xff]  ;;  %v2866_v37 = vld [vmem:[#allocation7 + $0x150] sm:$0xff] }
 0x1bc   :  { %v730_v50 = vmul.f32 %v2110_v4, %v729_v45  ;;  %v743_v54 = vmul.f32 %v725_v12, %v2791_v5  ;;  %v2802_v5 = vld [vmem:[#allocation7 + $0x1e0] sm:$0xff]  ;;  %1068 = vmatpush.msra.mxu2 %v2818_v15  ;;  %3563 = vst [vmem:[#allocation43_spill] sm:$0xff] %v2858_v32  ;;  %v2870_v41 = vld [vmem:[#allocation7 + $0x158] sm:$0xff]  ;;  %v2876_v46 = vld [vmem:[#allocation7 + $0x128] sm:$0xff] }
 0x1bd   :  { %1027 = vmatpush.msra.mxu0 %v2802_v5  ;;  %1049 = vmatpush.msra.mxu1 %v2828_v17  ;;  %3564 = vst [vmem:[#allocation44_spill] sm:$0xff] %v2866_v37  ;;  %v2874_v45 = vld [vmem:[#allocation7 + $0x120] sm:$0xff]  ;;  %v2878_v6 = vld [vmem:[#allocation7 + $0x130] sm:$0xff]  ;;  %v2882_v12 = vld [vmem:[#allocation7 + $0x138] sm:$0xff] }
 0x1be   :  { %v2799_v42 = vadd.f32 %v744_v49, %v743_v54  ;;  %v731_v55 = vadd.f32 %v2110_v4, %v730_v50  ;;  %1069 = vmatpush.msra.mxu2 %v2830_v20  ;;  %1089 = vmatpush.msra.mxu3 %v2834_v23  ;;  %3565 = vst [vmem:[#allocation45_spill] sm:$0xff] %v2870_v41  ;;  %v2886_v49 = vld [vmem:[#allocation7 + $0x100] sm:$0xff]  ;;  %v2888_v50 = vld [vmem:[#allocation7 + $0x108] sm:$0xff]  ;;  %v2890_v54 = vld [vmem:[#allocation7 + $0x110] sm:$0xff] }
 0x1bf   :  { %1028 = vmatpush.msra.mxu0 %v2814_v11  ;;  %1050 = vmatpush.msra.mxu1 %v2840_v28  ;;  %3566 = vst [vmem:[#allocation46_spill] sm:$0xff] %v2874_v45 }
 0x1c0   :  { %2113 = vtanh.f32 %v2799_v42  ;;  %v735_v62 = vsel %vm734_vm6, %v2110_v4, %v731_v55  ;;  %1070 = vmatpush.msra.mxu2 %v2842_v1  ;;  %1090 = vmatpush.msra.mxu3 %v2846_v2  ;;  %v2850_v4 = vld [vmem:[#allocation7 + $0x160] sm:$0xff]  ;;  %3567 = vst [vmem:[#allocation47_spill] sm:$0xff] %v2876_v46  ;;  %v2894_v55 = vld [vmem:[#allocation7 + $0x118] sm:$0xff] }
 0x1c1   :  { %v740_v13 = vsel %vm737_vm7, %v739_v63, %v735_v62  ;;  %1029 = vmatpush.msra.mxu0 %v2826_v19  ;;  %1051 = vmatpush.msra.mxu1 %v2852_v29  ;;  %v2902_v62 = vld [vmem:[#allocation7 + $0xf0] sm:$0xff]  ;;  %v2906_v63 = vld [vmem:[#allocation7 + $0xf8] sm:$0xff] }
 0x1c2   :  { %1071 = vmatpush.msra.mxu2 %v2854_v18  ;;  %1091 = vmatpush.msra.mxu3 %v2858_v32 }
 0x1c3   :  { %1030 = vmatpush.msra.mxu0 %v2838_v24  ;;  %1052 = vmatpush.msra.mxu1 %v2864_v36 }
 0x1c4   :  { %1072 = vmatpush.msra.mxu2 %v2866_v37  ;;  %1092 = vmatpush.msra.mxu3 %v2870_v41 }
 0x1c5   :  { %1031 = vmatpush.msra.mxu0 %v2850_v4  ;;  %1053 = vmatpush.msra.mxu1 %v2876_v46 }
 0x1c6   :  { %v2114_v52 = vpop.eup %2113  ;;  %1073 = vmatpush.msra.mxu2 %v2878_v6  ;;  %1093 = vmatpush.msra.mxu3 %v2882_v12 }
 0x1c7   :  { %v747_v7 = vmul.f32 %v2114_v52, %v740_v13  ;;  %1032 = vmatpush.msra.mxu0 %v2862_v33  ;;  %1054 = vmatpush.msra.mxu1 %v2888_v50 }
 0x1c8   :  { %1074 = vmatpush.msra.mxu2 %v2890_v54  ;;  %1094 = vmatpush.msra.mxu3 %v2894_v55 }
 0x1c9   :  { %749 = vst [vmem:[#allocation10 + $0x8] sm:$0xff] %v747_v7  ;;  %830 = vmatmul.f32.vlgmr.msrb.gmra.mxu0 %v747_v7  ;;  %850 = vmatmul.f32.vlgmr.msrb.gmra.mxu1 %v747_v7 }
 0x1ca   :  { %870 = vmatmul.f32.vlgmr.msrb.gmra.mxu2 %v747_v7  ;;  %890 = vmatmul.f32.vlgmr.msrb.gmra.mxu3 %v747_v7  ;;  %v2910_v7 = vld [vmem:[#allocation7 + $0xc0] sm:$0xff] }
 0x1cb   :  { %1033 = vmatpush.msra.mxu0 %v2874_v45  ;;  %1055 = vmatpush.msra.mxu1 %v2900_v59 }
 0x1cc   :  { %1075 = vmatpush.msra.mxu2 %v2902_v62  ;;  %1095 = vmatpush.msra.mxu3 %v2906_v63 }
 0x1cd   :  { %1034 = vmatpush.msra.mxu0 %v2886_v49  ;;  %1056 = vmatpush.msra.mxu1 %v2912_v9 }
 0x1ce   :  { %1076 = vmatpush.msra.mxu2 %v2914_v8  ;;  %1096 = vmatpush.msra.mxu3 %v2920_v61 }
 0x1cf   :  { %1035 = vmatpush.msra.mxu0 %v2898_v58  ;;  %1057 = vmatpush.msra.mxu1 %v2926_v57 }
 0x1d0   :  { %1077 = vmatpush.msra.mxu2 %v2928_v56 }
 0x1d1   :  { %1036 = vmatpush.msra.mxu0 %v2910_v7 }
 0x1d2   :  { %1078 = vmatpush.msra.mxu2 %v2940_v51 }
 0x1d3   :  { %1037 = vmatpush.msra.mxu0 %v2924_v60 }
 0x1d4   :  { %1079 = vmatpush.msra.mxu2 %v2952_v47 }
 0x1d6   :  { %1080 = vmatpush.msra.mxu2 %v2962_v38 }
 0x1d8   :  { %1081 = vmatpush.msra.mxu2 %v2975_v30 }
 0x246   :  { %v831_v52 = vpop.f32.mrf.mxu0  ;;  %v851_v13 = vpop.f32.mrf.mxu1 }
 0x247   :  { %v894_v39 = vadd.f32 %v831_v52, %v2727_v21  ;;  %v895_v26 = vadd.f32 %v851_v13, %v2729_v22  ;;  %v2932_v22 = vld [vmem:[#allocation7 + $0xb8] sm:$0xff]  ;;  %v2936_v52 = vld [vmem:[#allocation7 + $0x80] sm:$0xff]  ;;  %v2938_v13 = vld [vmem:[#allocation7 + $0x88] sm:$0xff] }
 0x248   :  { %1097 = vmatpush.msra.mxu3 %v2932_v22  ;;  %1038 = vmatpush.msra.mxu0 %v2936_v52 }
 0x249   :  { %v2055_v53 = vmul.f32 -1.442695, %v894_v39  ;;  %v2056_v21 = vmul.f32 -1.442695, %v895_v26  ;;  %1058 = vmatpush.msra.mxu1 %v2938_v13  ;;  %v2944_v26 = vld [vmem:[#allocation7 + $0x98] sm:$0xff]  ;;  %v2946_v39 = vld [vmem:[#allocation7 + $0x60] sm:$0xff] }
 0x24a   :  { %3568 = vst [vmem:[#allocation48_spill] sm:$0xff] %v2944_v26  ;;  %1098 = vmatpush.msra.mxu3 %v2944_v26  ;;  %1039 = vmatpush.msra.mxu0 %v2946_v39 }
 0x24b   :  { %2115 = vpow2.f32 %v2055_v53  ;;  %3569 = vst [vmem:[#allocation49_spill] sm:$0xff] %v2946_v39  ;;  %v2956_v53 = vld [vmem:[#allocation7 + $0x40] sm:$0xff]  ;;  %1059 = vmatpush.msra.mxu1 %v2948_v48  ;;  %v2977_v48 = vld [vmem:[#allocation7 + $0x38] sm:$0xff] }
 0x24c   :  { %2117 = vpow2.f32 %v2056_v21  ;;  %3573 = vst [vmem:[#allocation53_spill] sm:$0xff] %v2956_v53  ;;  %v2964_v21 = vld [vmem:[#allocation7 + $0x58] sm:$0xff]  ;;  %1099 = vmatpush.msra.mxu3 %v2954_v44  ;;  %1040 = vmatpush.msra.mxu0 %v2956_v53  ;;  %v2987_v53 = vld [vmem:[#allocation7 + $0x10] sm:$0xff] }
 0x24d   :  { %v871_v43 = vpop.f32.mrf.mxu2  ;;  %1060 = vmatpush.msra.mxu1 %v2960_v40  ;;  %v2989_v40 = vld [vmem:[#allocation7 + $0x18] sm:$0xff]  ;;  %1082 = vmatpush.msra.mxu2 %v2987_v53 }
 0x24e   :  { %v896_v35 = vadd.f32 %v871_v43, %v2732_v25  ;;  %1100 = vmatpush.msra.mxu3 %v2964_v21  ;;  %v2981_v25 = vld [vmem:[#allocation7] sm:$0xff]  ;;  %v2983_v43 = vld [vmem:[#allocation7 + $0x8] sm:$0xff]  ;;  %1041 = vmatpush.msra.mxu0 %v2969_v34 }
 0x24f   :  { %1061 = vmatpush.msra.mxu1 %v2971_v31  ;;  %1280 = vmatpush.msrb.mxu2 %v2806_v0 }
 0x250   :  { %v2057_v39 = vmul.f32 -1.442695, %v896_v35  ;;  %1101 = vmatpush.msra.mxu3 %v2977_v48  ;;  %1042 = vmatpush.msra.mxu0 %v2981_v25 }
 0x251   :  { %v2116_v44 = vpop.eup %2115  ;;  %1062 = vmatpush.msra.mxu1 %v2983_v43  ;;  %1281 = vmatpush.msrb.mxu2 %v2818_v15 }
 0x252   :  { %v2118_v47 = vpop.eup %2117  ;;  %v2991_v26 = vadd.f32 1.0, %v2116_v44  ;;  %2119 = vpow2.f32 %v2057_v39  ;;  %1102 = vmatpush.msra.mxu3 %v2989_v40  ;;  %1240 = vmatpush.msrb.mxu0 %v2802_v5  ;;  %v891_v44 = vpop.f32.mrf.mxu3 }
 0x253   :  { %v2995_v35 = vadd.f32 1.0, %v2118_v47  ;;  %1260 = vmatpush.msrb.mxu1 %v2804_v14  ;;  %v897_v0 = vadd.f32 %v891_v44, %v2735_v27  ;;  %1282 = vmatpush.msrb.mxu2 %v2830_v20 }
 0x254   :  { %2121 = vrcp.f32 %v2991_v26  ;;  %1300 = vmatpush.msrb.mxu3 %v2810_v10  ;;  %1241 = vmatpush.msrb.mxu0 %v2814_v11  ;;  %vm915_vm10 = vweird.f32 %v2991_v26 }
 0x255   :  { %2123 = vrcp.f32 %v2995_v35  ;;  %1261 = vmatpush.msrb.mxu1 %v2816_v3  ;;  %1283 = vmatpush.msrb.mxu2 %v2842_v1  ;;  %v919_v1 = vand.u32 2147483647, %v2991_v26  ;;  %vm930_vm11 = vweird.f32 %v2995_v35 }
 0x256   :  { %1301 = vmatpush.msrb.mxu3 %v2822_v16  ;;  %1242 = vmatpush.msrb.mxu0 %v2826_v19 }
 0x257   :  { %1262 = vmatpush.msrb.mxu1 %v2828_v17  ;;  %1284 = vmatpush.msrb.mxu2 %v2854_v18  ;;  %vm920_vm14 = vcmp.eq.f32.partialorder %v919_v1, 8.507059e+37 }
 0x258   :  { %v2120_v47 = vpop.eup %2119  ;;  %1302 = vmatpush.msrb.mxu3 %v2834_v23  ;;  %1243 = vmatpush.msrb.mxu0 %v2838_v24  ;;  %v921_v23 = vand.u32 2147483648, %v2991_v26 }
 0x259   :  { %v3011_v39 = vadd.f32 1.0, %v2120_v47  ;;  %1263 = vmatpush.msrb.mxu1 %v2840_v28  ;;  %v936_v28 = vand.u32 2147483648, %v2995_v35  ;;  %1285 = vmatpush.msrb.mxu2 %v2866_v37 }
 0x25a   :  { %v2122_v14 = vpop.eup %2121  ;;  %1303 = vmatpush.msrb.mxu3 %v2846_v2  ;;  %1244 = vmatpush.msrb.mxu0 %v2850_v4 }
 0x25b   :  { %v2124_v11 = vpop.eup %2123  ;;  %v911_v3 = vmul.f32 %v2122_v14, %v2991_v26  ;;  %2125 = vrcp.f32 %v3011_v39  ;;  %1264 = vmatpush.msrb.mxu1 %v2852_v29  ;;  %vm916_vm8 = vweird.f32 %v2122_v14  ;;  %1286 = vmatpush.msrb.mxu2 %v2878_v6  ;;  %vm945_vm1 = vweird.f32 %v3011_v39 }
 0x25c   :  { %v926_v47 = vmul.f32 %v2124_v11, %v2995_v35  ;;  %2127 = vtanh.f32 %v897_v0  ;;  %1304 = vmatpush.msrb.mxu3 %v2858_v32  ;;  %1245 = vmatpush.msrb.mxu0 %v2862_v33  ;;  %vm931_vm9 = vweird.f32 %v2124_v11  ;;  %vm917_vm12 = vmor %vm915_vm10, %vm916_vm8 }
 0x25d   :  { %v912_v27 = vsub.f32 1.0, %v911_v3  ;;  %1265 = vmatpush.msrb.mxu1 %v2864_v36  ;;  %vm932_vm13 = vmor %vm930_vm11, %vm931_vm9  ;;  %1287 = vmatpush.msrb.mxu2 %v2890_v54 }
 0x25e   :  { %v927_v44 = vsub.f32 1.0, %v926_v47  ;;  %v934_v47 = vand.u32 2147483647, %v2995_v35  ;;  %1305 = vmatpush.msrb.mxu3 %v2870_v41  ;;  %1246 = vmatpush.msrb.mxu0 %v2874_v45 }
 0x25f   :  { %v913_v24 = vmul.f32 %v2122_v14, %v912_v27  ;;  %1266 = vmatpush.msrb.mxu1 %v2876_v46  ;;  %1288 = vmatpush.msrb.mxu2 %v2902_v62 }
 0x260   :  { %v928_v3 = vmul.f32 %v2124_v11, %v927_v44  ;;  %v922_v44 = vor.u32 1.1754944e-38, %v921_v23  ;;  %1306 = vmatpush.msrb.mxu3 %v2882_v12  ;;  %1247 = vmatpush.msrb.mxu0 %v2886_v49  ;;  %vm935_vm15 = vcmp.eq.f32.partialorder %v934_v47, 8.507059e+37 }
 0x261   :  { %v3037_v0 = vpop.eup %2125  ;;  %v914_v32 = vadd.f32 %v2122_v14, %v913_v24  ;;  %v937_v24 = vor.u32 1.1754944e-38, %v936_v28  ;;  %1267 = vmatpush.msrb.mxu1 %v2888_v50  ;;  %1289 = vmatpush.msrb.mxu2 %v2914_v8 }
 0x262   :  { %v941_v27 = vmul.f32 %v3037_v0, %v3011_v39  ;;  %v929_v37 = vadd.f32 %v2124_v11, %v928_v3  ;;  %v2128_v35 = vpop.eup %2127  ;;  %1307 = vmatpush.msrb.mxu3 %v2894_v55  ;;  %1248 = vmatpush.msrb.mxu0 %v2898_v58  ;;  %vm946_vm0 = vweird.f32 %v3037_v0 }
 0x263   :  { %v918_v26 = vsel %vm917_vm12, %v2122_v14, %v914_v32  ;;  %1268 = vmatpush.msrb.mxu1 %v2900_v59  ;;  %1290 = vmatpush.msrb.mxu2 %v2928_v56  ;;  %v949_v32 = vand.u32 2147483647, %v3011_v39  ;;  %vm947_vm2 = vmor %vm945_vm1, %vm946_vm0 }
 0x264   :  { %v942_v46 = vsub.f32 1.0, %v941_v27  ;;  %v923_v45 = vsel %vm920_vm14, %v922_v44, %v918_v26  ;;  %v933_v41 = vsel %vm932_vm13, %v2124_v11, %v929_v37  ;;  %1308 = vmatpush.msrb.mxu3 %v2906_v63  ;;  %1249 = vmatpush.msrb.mxu0 %v2910_v7  ;;  %v3575_v37 = vld [vmem:[#allocation48_spill] sm:$0xff]  ;;  %v3578_v27 = vld [vmem:[#allocation51_spill] sm:$0xff] }
 0x265   :  { %v938_v23 = vsel %vm935_vm15, %v937_v24, %v933_v41  ;;  %v957_v3 = vmul.f32 %v2128_v35, %v923_v45  ;;  %1269 = vmatpush.msrb.mxu1 %v2912_v9  ;;  %1291 = vmatpush.msrb.mxu2 %v2940_v51  ;;  %v3576_v45 = vld [vmem:[#allocation49_spill] sm:$0xff]  ;;  %v3579_v44 = vld [vmem:[#allocation52_spill] sm:$0xff]  ;;  %vm950_vm3 = vcmp.eq.f32.partialorder %v949_v32, 8.507059e+37  ;;  %v3581_v24 = vld [vmem:[#allocation54_spill] sm:$0xff] }
 0x266   :  { %v943_v14 = vmul.f32 %v3037_v0, %v942_v46  ;;  %v956_v28 = vmul.f32 %v938_v23, %v2799_v42  ;;  %1309 = vmatpush.msrb.mxu3 %v2920_v61  ;;  %1250 = vmatpush.msrb.mxu0 %v2924_v60  ;;  %v951_v42 = vand.u32 2147483648, %v3011_v39  ;;  %v3577_v46 = vld [vmem:[#allocation50_spill] sm:$0xff]  ;;  %v3580_v39 = vld [vmem:[#allocation53_spill] sm:$0xff]  ;;  %v3582_v23 = vld [vmem:[#allocation35_spill] sm:$0xff] }
 0x267   :  { %1270 = vmatpush.msrb.mxu1 %v2926_v57  ;;  %1292 = vmatpush.msrb.mxu2 %v3578_v27 }
 0x268   :  { %v3061_v11 = vadd.f32 %v957_v3, %v956_v28  ;;  %v944_v1 = vadd.f32 %v3037_v0, %v943_v14  ;;  %1310 = vmatpush.msrb.mxu3 %v2932_v22  ;;  %1251 = vmatpush.msrb.mxu0 %v2936_v52  ;;  %v952_v47 = vor.u32 1.1754944e-38, %v951_v42  ;;  %v3583_v3 = vld [vmem:[#allocation36_spill] sm:$0xff]  ;;  %v3584_v14 = vld [vmem:[#allocation37_spill] sm:$0xff]  ;;  %v3585_v28 = vld [vmem:[#allocation38_spill] sm:$0xff] }
 0x269   :  { %1271 = vmatpush.msrb.mxu1 %v2938_v13  ;;  %1293 = vmatpush.msrb.mxu2 %v2962_v38  ;;  %v3588_v42 = vld [vmem:[#allocation41_spill] sm:$0xff] }
 0x26a   :  { %2129 = vtanh.f32 %v3061_v11  ;;  %1311 = vmatpush.msrb.mxu3 %v3575_v37  ;;  %v948_v41 = vsel %vm947_vm2, %v3037_v0, %v944_v1  ;;  %1252 = vmatpush.msrb.mxu0 %v3576_v45  ;;  %v3587_v1 = vld [vmem:[#allocation40_spill] sm:$0xff] }
 0x26b   :  { %1272 = vmatpush.msrb.mxu1 %v3577_v46  ;;  %v953_v35 = vsel %vm950_vm3, %v952_v47, %v948_v41  ;;  %1294 = vmatpush.msrb.mxu2 %v2975_v30 }
 0x26c   :  { %1312 = vmatpush.msrb.mxu3 %v3579_v44  ;;  %1253 = vmatpush.msrb.mxu0 %v3580_v39 }
 0x26d   :  { %1273 = vmatpush.msrb.mxu1 %v3581_v24  ;;  %1295 = vmatpush.msrb.mxu2 %v2987_v53 }
 0x26e   :  { %1313 = vmatpush.msrb.mxu3 %v2964_v21  ;;  %1254 = vmatpush.msrb.mxu0 %v2969_v34 }
 0x26f   :  { %1274 = vmatpush.msrb.mxu1 %v2971_v31 }
 0x270   :  { %v2130_v26 = vpop.eup %2129  ;;  %1314 = vmatpush.msrb.mxu3 %v2977_v48  ;;  %1255 = vmatpush.msrb.mxu0 %v2981_v25 }
 0x271   :  { %v960_v0 = vmul.f32 %v2130_v26, %v953_v35  ;;  %1275 = vmatpush.msrb.mxu1 %v2983_v43 }
 0x272   :  { %1315 = vmatpush.msrb.mxu3 %v2989_v40 }
 0x273   :  { %962 = vst [vmem:[#allocation10 + $0x10] sm:$0xff] %v960_v0  ;;  %1043 = vmatmul.f32.vlgmr.msra.gmra.mxu0 %v960_v0  ;;  %1063 = vmatmul.f32.vlgmr.msra.gmra.mxu1 %v960_v0 }
 0x274   :  { %1083 = vmatmul.f32.vlgmr.msra.gmra.mxu2 %v960_v0  ;;  %1103 = vmatmul.f32.vlgmr.msra.gmra.mxu3 %v960_v0 }
 0x275   :  { %1453 = vmatpush.msra.mxu0 %v2802_v5  ;;  %1473 = vmatpush.msra.mxu1 %v3582_v23  ;;  %v3586_v5 = vld [vmem:[#allocation39_spill] sm:$0xff] }
 0x276   :  { %1493 = vmatpush.msra.mxu2 %v3583_v3  ;;  %1513 = vmatpush.msra.mxu3 %v2810_v10  ;;  %v3589_v10 = vld [vmem:[#allocation42_spill] sm:$0xff] }
 0x277   :  { %1454 = vmatpush.msra.mxu0 %v3584_v14  ;;  %1474 = vmatpush.msra.mxu1 %v3585_v28 }
 0x278   :  { %1494 = vmatpush.msra.mxu2 %v2818_v15  ;;  %1514 = vmatpush.msra.mxu3 %v2822_v16  ;;  %v3590_v15 = vld [vmem:[#allocation43_spill] sm:$0xff]  ;;  %v3591_v16 = vld [vmem:[#allocation44_spill] sm:$0xff] }
 0x279   :  { %1455 = vmatpush.msra.mxu0 %v2826_v19  ;;  %1475 = vmatpush.msra.mxu1 %v2828_v17  ;;  %v3592_v19 = vld [vmem:[#allocation45_spill] sm:$0xff]  ;;  %v3593_v17 = vld [vmem:[#allocation46_spill] sm:$0xff] }
 0x27a   :  { %1495 = vmatpush.msra.mxu2 %v2830_v20  ;;  %1515 = vmatpush.msra.mxu3 %v3586_v5  ;;  %v3594_v20 = vld [vmem:[#allocation47_spill] sm:$0xff] }
 0x27b   :  { %1456 = vmatpush.msra.mxu0 %v3587_v1  ;;  %1476 = vmatpush.msra.mxu1 %v3588_v42 }
 0x27c   :  { %1496 = vmatpush.msra.mxu2 %v3589_v10  ;;  %1516 = vmatpush.msra.mxu3 %v2846_v2 }
 0x27d   :  { %1457 = vmatpush.msra.mxu0 %v2850_v4  ;;  %1477 = vmatpush.msra.mxu1 %v2852_v29 }
 0x27e   :  { %1497 = vmatpush.msra.mxu2 %v2854_v18  ;;  %1517 = vmatpush.msra.mxu3 %v3590_v15  ;;  %v3599_v15 = vld [vmem:[#allocation19_spill] sm:$0xff] }
 0x27f   :  { %1458 = vmatpush.msra.mxu0 %v2862_v33  ;;  %1478 = vmatpush.msra.mxu1 %v2864_v36 }
 0x280   :  { %1498 = vmatpush.msra.mxu2 %v3591_v16  ;;  %1518 = vmatpush.msra.mxu3 %v3592_v19  ;;  %v3600_v19 = vld [vmem:[#allocation20_spill] sm:$0xff] }
 0x281   :  { %1459 = vmatpush.msra.mxu0 %v3593_v17  ;;  %1479 = vmatpush.msra.mxu1 %v3594_v20 }
 0x282   :  { %1499 = vmatpush.msra.mxu2 %v2878_v6  ;;  %1519 = vmatpush.msra.mxu3 %v2882_v12  ;;  %v3598_v12 = vld [vmem:[#allocation18_spill] sm:$0xff] }
 0x283   :  { %1460 = vmatpush.msra.mxu0 %v2886_v49  ;;  %1480 = vmatpush.msra.mxu1 %v2888_v50 }
 0x284   :  { %1500 = vmatpush.msra.mxu2 %v2890_v54  ;;  %1520 = vmatpush.msra.mxu3 %v2894_v55 }
 0x285   :  { %1461 = vmatpush.msra.mxu0 %v2898_v58  ;;  %1481 = vmatpush.msra.mxu1 %v2900_v59 }
 0x286   :  { %1501 = vmatpush.msra.mxu2 %v2902_v62  ;;  %1521 = vmatpush.msra.mxu3 %v2906_v63 }
 0x287   :  { %1462 = vmatpush.msra.mxu0 %v2910_v7  ;;  %1482 = vmatpush.msra.mxu1 %v2912_v9 }
 0x288   :  { %1502 = vmatpush.msra.mxu2 %v2914_v8  ;;  %1522 = vmatpush.msra.mxu3 %v2920_v61 }
 0x289   :  { %1463 = vmatpush.msra.mxu0 %v2924_v60  ;;  %1483 = vmatpush.msra.mxu1 %v2926_v57  ;;  %v3596_v60 = vld [vmem:[#allocation16_spill] sm:$0xff] }
 0x28a   :  { %1503 = vmatpush.msra.mxu2 %v2928_v56  ;;  %1523 = vmatpush.msra.mxu3 %v2932_v22  ;;  %v3595_v56 = vld [vmem:[#allocation15_spill] sm:$0xff] }
 0x28b   :  { %1464 = vmatpush.msra.mxu0 %v2936_v52  ;;  %1484 = vmatpush.msra.mxu1 %v2938_v13 }
 0x28c   :  { %1504 = vmatpush.msra.mxu2 %v2940_v51  ;;  %1524 = vmatpush.msra.mxu3 %v3575_v37 }
 0x28d   :  { %1465 = vmatpush.msra.mxu0 %v3576_v45  ;;  %1485 = vmatpush.msra.mxu1 %v3577_v46 }
 0x28e   :  { %1505 = vmatpush.msra.mxu2 %v3578_v27  ;;  %1525 = vmatpush.msra.mxu3 %v3579_v44 }
 0x28f   :  { %1466 = vmatpush.msra.mxu0 %v3580_v39  ;;  %1486 = vmatpush.msra.mxu1 %v3581_v24 }
 0x290   :  { %1506 = vmatpush.msra.mxu2 %v2962_v38  ;;  %1526 = vmatpush.msra.mxu3 %v2964_v21 }
 0x291   :  { %1467 = vmatpush.msra.mxu0 %v2969_v34  ;;  %1487 = vmatpush.msra.mxu1 %v2971_v31 }
 0x292   :  { %1507 = vmatpush.msra.mxu2 %v2975_v30  ;;  %1527 = vmatpush.msra.mxu3 %v2977_v48  ;;  %v3597_v48 = vld [vmem:[#allocation17_spill] sm:$0xff] }
 0x293   :  { %1468 = vmatpush.msra.mxu0 %v2981_v25  ;;  %1488 = vmatpush.msra.mxu1 %v2983_v43 }
 0x294   :  { %1508 = vmatpush.msra.mxu2 %v2987_v53  ;;  %1528 = vmatpush.msra.mxu3 %v2989_v40 }
 0x2f0   :  { %v1044_v51 = vpop.f32.mrf.mxu0  ;;  %v1064_v38 = vpop.f32.mrf.mxu1 }
 0x2f1   :  { %v1107_v57 = vadd.f32 %v1044_v51, %v3595_v56  ;;  %v1108_v34 = vadd.f32 %v1064_v38, %v3596_v60  ;;  %v3601_v56 = vld [vmem:[#allocation21_spill] sm:$0xff] }
 0x2f3   :  { %v2058_v61 = vmul.f32 -1.442695, %v1107_v57  ;;  %v2059_v31 = vmul.f32 -1.442695, %v1108_v34 }
 0x2f5   :  { %2131 = vpow2.f32 %v2058_v61 }
 0x2f6   :  { %2133 = vpow2.f32 %v2059_v31 }
 0x2f7   :  { %v1084_v30 = vpop.f32.mrf.mxu2  ;;  %v1104_v40 = vpop.f32.mrf.mxu3 }
 0x2f8   :  { %v1109_v8 = vadd.f32 %v1084_v30, %v3597_v48  ;;  %v1110_v49 = vadd.f32 %v1104_v40, %v3598_v12 }
 0x2fa   :  { %v2060_v9 = vmul.f32 -1.442695, %v1109_v8 }
 0x2fb   :  { %v2132_v2 = vpop.eup %2131 }
 0x2fc   :  { %v2134_v4 = vpop.eup %2133  ;;  %v1120_v29 = vadd.f32 1.0, %v2132_v2  ;;  %2135 = vpow2.f32 %v2060_v9 }
 0x2fd   :  { %v1121_v18 = vadd.f32 1.0, %v2134_v4  ;;  %v3602_v4 = vld [vmem:[#allocation22_spill] sm:$0xff] }
 0x2fe   :  { %2137 = vrcp.f32 %v1120_v29  ;;  %v1134_v62 = vand.u32 2147483648, %v1120_v29  ;;  %v1132_v22 = vand.u32 2147483647, %v1120_v29  ;;  %vm1128_vm6 = vweird.f32 %v1120_v29 }
 0x2ff   :  { %2139 = vrcp.f32 %v1121_v18  ;;  %v1149_v63 = vand.u32 2147483648, %v1121_v18  ;;  %v1147_v13 = vand.u32 2147483647, %v1121_v18  ;;  %vm1143_vm7 = vweird.f32 %v1121_v18 }
 0x300   :  { %v1135_v43 = vor.u32 1.1754944e-38, %v1134_v62  ;;  %vm1133_vm10 = vcmp.eq.f32.partialorder %v1132_v22, 8.507059e+37 }
 0x301   :  { %v1150_v37 = vor.u32 1.1754944e-38, %v1149_v63  ;;  %vm1148_vm11 = vcmp.eq.f32.partialorder %v1147_v13, 8.507059e+37 }
 0x302   :  { %v2136_v33 = vpop.eup %2135 }
 0x303   :  { %v1122_v36 = vadd.f32 1.0, %v2136_v33 }
 0x304   :  { %v2138_v6 = vpop.eup %2137 }
 0x305   :  { %v2140_v50 = vpop.eup %2139  ;;  %v1124_v54 = vmul.f32 %v2138_v6, %v1120_v29  ;;  %2141 = vrcp.f32 %v1122_v36  ;;  %vm1129_vm4 = vweird.f32 %v2138_v6  ;;  %v1164_v23 = vand.u32 2147483648, %v1122_v36 }
 0x306   :  { %v1139_v55 = vmul.f32 %v2140_v50, %v1121_v18  ;;  %2143 = vtanh.f32 %v1110_v49  ;;  %vm1144_vm5 = vweird.f32 %v2140_v50  ;;  %vm1130_vm8 = vmor %vm1128_vm6, %vm1129_vm4  ;;  %vm1158_vm13 = vweird.f32 %v1122_v36 }
 0x307   :  { %v1125_v58 = vsub.f32 1.0, %v1124_v54  ;;  %vm1145_vm9 = vmor %vm1143_vm7, %vm1144_vm5  ;;  %v1162_v3 = vand.u32 2147483647, %v1122_v36  ;;  %v1165_v28 = vor.u32 1.1754944e-38, %v1164_v23 }
 0x308   :  { %v1140_v59 = vsub.f32 1.0, %v1139_v55 }
 0x309   :  { %v1126_v7 = vmul.f32 %v2138_v6, %v1125_v58  ;;  %vm1163_vm15 = vcmp.eq.f32.partialorder %v1162_v3, 8.507059e+37  ;;  %v3178_v3 = vld [vmem:[#allocation7 + $0x1e8] sm:$0xff] }
 0x30a   :  { %v1141_v52 = vmul.f32 %v2140_v50, %v1140_v59 }
 0x30b   :  { %v2142_v53 = vpop.eup %2141  ;;  %v1127_v21 = vadd.f32 %v2138_v6, %v1126_v7 }
 0x30c   :  { %v1154_v25 = vmul.f32 %v2142_v53, %v1122_v36  ;;  %v1142_v32 = vadd.f32 %v2140_v50, %v1141_v52  ;;  %v2144_v45 = vpop.eup %2143  ;;  %vm1159_vm12 = vweird.f32 %v2142_v53 }
 0x30d   :  { %v1131_v41 = vsel %vm1130_vm8, %v2138_v6, %v1127_v21  ;;  %vm1160_vm14 = vmor %vm1158_vm13, %vm1159_vm12 }
 0x30e   :  { %v1155_v46 = vsub.f32 1.0, %v1154_v25  ;;  %v1136_v47 = vsel %vm1133_vm10, %v1135_v43, %v1131_v41  ;;  %v1146_v27 = vsel %vm1145_vm9, %v2140_v50, %v1142_v32 }
 0x30f   :  { %v1151_v44 = vsel %vm1148_vm11, %v1150_v37, %v1146_v27  ;;  %v1170_v39 = vmul.f32 %v2144_v45, %v1136_v47 }
 0x310   :  { %v1156_v24 = vmul.f32 %v2142_v53, %v1155_v46  ;;  %v1169_v26 = vmul.f32 %v1151_v44, %v3061_v11 }
 0x312   :  { %v3165_v35 = vadd.f32 %v1170_v39, %v1169_v26  ;;  %v1157_v0 = vadd.f32 %v2142_v53, %v1156_v24 }
 0x314   :  { %2145 = vtanh.f32 %v3165_v35  ;;  %v1161_v14 = vsel %vm1160_vm14, %v2142_v53, %v1157_v0 }
 0x315   :  { %v1166_v1 = vsel %vm1163_vm15, %v1165_v28, %v1161_v14  ;;  %v3180_v14 = vld [vmem:[#allocation7 + $0x1f0] sm:$0xff]  ;;  %v3184_v28 = vld [vmem:[#allocation7 + $0x1f8] sm:$0xff] }
 0x31a   :  { %v2146_v5 = vpop.eup %2145 }
 0x31b   :  { %v1173_v42 = vmul.f32 %v2146_v5, %v1166_v1  ;;  %v3188_v5 = vld [vmem:[#allocation7 + $0x1c0] sm:$0xff]  ;;  %v3190_v1 = vld [vmem:[#allocation7 + $0x1c8] sm:$0xff] }
 0x31d   :  { %1175 = vst [vmem:[#allocation10 + $0x18] sm:$0xff] %v1173_v42  ;;  %1256 = vmatmul.f32.vlgmr.msrb.gmra.mxu0 %v1173_v42  ;;  %1276 = vmatmul.f32.vlgmr.msrb.gmra.mxu1 %v1173_v42 }
 0x31e   :  { %1296 = vmatmul.f32.vlgmr.msrb.gmra.mxu2 %v1173_v42  ;;  %1316 = vmatmul.f32.vlgmr.msrb.gmra.mxu3 %v1173_v42  ;;  %v3192_v42 = vld [vmem:[#allocation7 + $0x1d0] sm:$0xff] }
 0x31f   :  { %1686 = vmatpush.msrb.mxu1 %v3178_v3  ;;  %1706 = vmatpush.msrb.mxu2 %v3180_v14 }
 0x320   :  { %1726 = vmatpush.msrb.mxu3 %v3184_v28 }
 0x321   :  { %1687 = vmatpush.msrb.mxu1 %v3190_v1  ;;  %1707 = vmatpush.msrb.mxu2 %v3192_v42 }
 0x39a   :  { %v1257_v11 = vpop.f32.mrf.mxu0  ;;  %v1277_v10 = vpop.f32.mrf.mxu1 }
 0x39b   :  { %v1320_v16 = vadd.f32 %v1257_v11, %v3599_v15  ;;  %v1321_v17 = vadd.f32 %v1277_v10, %v3600_v19  ;;  %v3196_v11 = vld [vmem:[#allocation7 + $0x1d8] sm:$0xff]  ;;  %v3200_v10 = vld [vmem:[#allocation7 + $0x1a0] sm:$0xff]  ;;  %v3202_v15 = vld [vmem:[#allocation7 + $0x1a8] sm:$0xff] }
 0x39c   :  { %1727 = vmatpush.msrb.mxu3 %v3196_v11  ;;  %1688 = vmatpush.msrb.mxu1 %v3202_v15  ;;  %v3208_v19 = vld [vmem:[#allocation7 + $0x1b8] sm:$0xff] }
 0x39d   :  { %v2061_v20 = vmul.f32 -1.442695, %v1320_v16  ;;  %v2062_v51 = vmul.f32 -1.442695, %v1321_v17  ;;  %v3204_v16 = vld [vmem:[#allocation7 + $0x1b0] sm:$0xff]  ;;  %v3212_v17 = vld [vmem:[#allocation7 + $0x180] sm:$0xff] }
 0x39e   :  { %1708 = vmatpush.msrb.mxu2 %v3204_v16  ;;  %1728 = vmatpush.msrb.mxu3 %v3208_v19 }
 0x39f   :  { %2147 = vpow2.f32 %v2061_v20  ;;  %v3214_v20 = vld [vmem:[#allocation7 + $0x188] sm:$0xff] }
 0x3a0   :  { %2149 = vpow2.f32 %v2062_v51  ;;  %v3216_v51 = vld [vmem:[#allocation7 + $0x190] sm:$0xff]  ;;  %1689 = vmatpush.msrb.mxu1 %v3214_v20 }
 0x3a1   :  { %v1297_v38 = vpop.f32.mrf.mxu2  ;;  %v1317_v48 = vpop.f32.mrf.mxu3  ;;  %1709 = vmatpush.msrb.mxu2 %v3216_v51 }
 0x3a2   :  { %v1322_v57 = vadd.f32 %v1297_v38, %v3601_v56  ;;  %v1323_v29 = vadd.f32 %v1317_v48, %v3602_v4  ;;  %v3220_v38 = vld [vmem:[#allocation7 + $0x198] sm:$0xff]  ;;  %v3224_v56 = vld [vmem:[#allocation7 + $0x160] sm:$0xff] }
 0x3a3   :  { %1729 = vmatpush.msrb.mxu3 %v3220_v38  ;;  %v3244_v48 = vld [vmem:[#allocation7 + $0x158] sm:$0xff] }
 0x3a4   :  { %v2063_v60 = vmul.f32 -1.442695, %v1322_v57  ;;  %v3226_v57 = vld [vmem:[#allocation7 + $0x168] sm:$0xff]  ;;  %v3256_v4 = vld [vmem:[#allocation7 + $0x138] sm:$0xff] }
 0x3a5   :  { %v2148_v34 = vpop.eup %2147  ;;  %1690 = vmatpush.msrb.mxu1 %v3226_v57 }
 0x3a6   :  { %v2150_v61 = vpop.eup %2149  ;;  %v1333_v31 = vadd.f32 1.0, %v2148_v34  ;;  %2151 = vpow2.f32 %v2063_v60  ;;  %v3228_v60 = vld [vmem:[#allocation7 + $0x170] sm:$0xff]  ;;  %v3232_v34 = vld [vmem:[#allocation7 + $0x178] sm:$0xff] }
 0x3a7   :  { %v1334_v30 = vadd.f32 1.0, %v2150_v61  ;;  %1710 = vmatpush.msrb.mxu2 %v3228_v60  ;;  %1730 = vmatpush.msrb.mxu3 %v3232_v34  ;;  %v3236_v61 = vld [vmem:[#allocation7 + $0x140] sm:$0xff] }
 0x3a8   :  { %2153 = vrcp.f32 %v1333_v31  ;;  %v1347_v12 = vand.u32 2147483648, %v1333_v31  ;;  %v1345_v54 = vand.u32 2147483647, %v1333_v31  ;;  %vm1341_vm2 = vweird.f32 %v1333_v31 }
 0x3a9   :  { %2155 = vrcp.f32 %v1334_v30  ;;  %v1362_v49 = vand.u32 2147483648, %v1334_v30  ;;  %v1360_v58 = vand.u32 2147483647, %v1334_v30  ;;  %vm1356_vm3 = vweird.f32 %v1334_v30  ;;  %1731 = vmatpush.msrb.mxu3 %v3244_v48 }
 0x3aa   :  { %v1348_v7 = vor.u32 1.1754944e-38, %v1347_v12  ;;  %vm1346_vm6 = vcmp.eq.f32.partialorder %v1345_v54, 8.507059e+37  ;;  %v3276_v12 = vld [vmem:[#allocation7 + $0xf0] sm:$0xff] }
 0x3ab   :  { %v1363_v52 = vor.u32 1.1754944e-38, %v1362_v49  ;;  %vm1361_vm7 = vcmp.eq.f32.partialorder %v1360_v58, 8.507059e+37  ;;  %1732 = vmatpush.msrb.mxu3 %v3256_v4  ;;  %v3280_v49 = vld [vmem:[#allocation7 + $0xf8] sm:$0xff]  ;;  %v3286_v58 = vld [vmem:[#allocation7 + $0xc8] sm:$0xff] }
 0x3ac   :  { %v2152_v8 = vpop.eup %2151 }
 0x3ad   :  { %v1335_v9 = vadd.f32 1.0, %v2152_v8  ;;  %v3248_v8 = vld [vmem:[#allocation7 + $0x120] sm:$0xff] }
 0x3ae   :  { %v2154_v2 = vpop.eup %2153 }
 0x3af   :  { %v2156_v18 = vpop.eup %2155  ;;  %v1337_v40 = vmul.f32 %v2154_v2, %v1333_v31  ;;  %2157 = vrcp.f32 %v1335_v9  ;;  %vm1342_vm0 = vweird.f32 %v2154_v2  ;;  %v1377_v27 = vand.u32 2147483648, %v1335_v9  ;;  %v3238_v31 = vld [vmem:[#allocation7 + $0x148] sm:$0xff] }
 0x3b0   :  { %v1352_v33 = vmul.f32 %v2156_v18, %v1334_v30  ;;  %2159 = vtanh.f32 %v1323_v29  ;;  %vm1357_vm1 = vweird.f32 %v2156_v18  ;;  %vm1343_vm4 = vmor %vm1341_vm2, %vm1342_vm0  ;;  %vm1371_vm9 = vweird.f32 %v1335_v9  ;;  %v3240_v30 = vld [vmem:[#allocation7 + $0x150] sm:$0xff]  ;;  %1691 = vmatpush.msrb.mxu1 %v3238_v31  ;;  %v3260_v29 = vld [vmem:[#allocation7 + $0x100] sm:$0xff] }
 0x3b1   :  { %v1338_v36 = vsub.f32 1.0, %v1337_v40  ;;  %vm1358_vm5 = vmor %vm1356_vm3, %vm1357_vm1  ;;  %v1375_v44 = vand.u32 2147483647, %v1335_v9  ;;  %v1378_v24 = vor.u32 1.1754944e-38, %v1377_v27  ;;  %1711 = vmatpush.msrb.mxu2 %v3240_v30  ;;  %v3264_v40 = vld [vmem:[#allocation7 + $0x110] sm:$0xff]  ;;  %v3320_v27 = vld [vmem:[#allocation7 + $0x60] sm:$0xff] }
 0x3b2   :  { %v1353_v6 = vsub.f32 1.0, %v1352_v33  ;;  %v3268_v33 = vld [vmem:[#allocation7 + $0x118] sm:$0xff]  ;;  %3605 = vst [vmem:[#allocation48_spill] sm:$0xff] %v3320_v27 }
 0x3b3   :  { %v1339_v50 = vmul.f32 %v2154_v2, %v1338_v36  ;;  %vm1376_vm11 = vcmp.eq.f32.partialorder %v1375_v44, 8.507059e+37  ;;  %1733 = vmatpush.msrb.mxu3 %v3268_v33  ;;  %v3272_v36 = vld [vmem:[#allocation7 + $0xe0] sm:$0xff]  ;;  %v3322_v44 = vld [vmem:[#allocation7 + $0x68] sm:$0xff] }
 0x3b4   :  { %v1354_v55 = vmul.f32 %v2156_v18, %v1353_v6  ;;  %v3274_v6 = vld [vmem:[#allocation7 + $0xe8] sm:$0xff]  ;;  %3606 = vst [vmem:[#allocation49_spill] sm:$0xff] %v3322_v44 }
 0x3b5   :  { %v2158_v59 = vpop.eup %2157  ;;  %v1340_v62 = vadd.f32 %v2154_v2, %v1339_v50  ;;  %1734 = vmatpush.msrb.mxu3 %v3280_v49 }
 0x3b6   :  { %v1367_v63 = vmul.f32 %v2158_v59, %v1335_v9  ;;  %v1355_v22 = vadd.f32 %v2156_v18, %v1354_v55  ;;  %v2160_v53 = vpop.eup %2159  ;;  %vm1372_vm8 = vweird.f32 %v2158_v59  ;;  %v3250_v9 = vld [vmem:[#allocation7 + $0x128] sm:$0xff]  ;;  %v3284_v55 = vld [vmem:[#allocation7 + $0xc0] sm:$0xff] }
 0x3b7   :  { %v1344_v13 = vsel %vm1343_vm4, %v2154_v2, %v1340_v62  ;;  %vm1373_vm10 = vmor %vm1371_vm9, %vm1372_vm8  ;;  %v3252_v2 = vld [vmem:[#allocation7 + $0x130] sm:$0xff]  ;;  %1692 = vmatpush.msrb.mxu1 %v3250_v9  ;;  %v3603_v62 = vld [vmem:[#allocation23_spill] sm:$0xff] }
 0x3b8   :  { %v1368_v21 = vsub.f32 1.0, %v1367_v63  ;;  %v1349_v25 = vsel %vm1346_vm6, %v1348_v7, %v1344_v13  ;;  %v1359_v43 = vsel %vm1358_vm5, %v2156_v18, %v1355_v22  ;;  %1712 = vmatpush.msrb.mxu2 %v3252_v2  ;;  %v3262_v18 = vld [vmem:[#allocation7 + $0x108] sm:$0xff]  ;;  %v3298_v13 = vld [vmem:[#allocation7 + $0xa0] sm:$0xff] }
 0x3b9   :  { %v1364_v32 = vsel %vm1361_vm7, %v1363_v52, %v1359_v43  ;;  %v1383_v37 = vmul.f32 %v2160_v53, %v1349_v25  ;;  %1693 = vmatpush.msrb.mxu1 %v3262_v18  ;;  %v3604_v7 = vld [vmem:[#allocation24_spill] sm:$0xff]  ;;  %v3294_v52 = vld [vmem:[#allocation7 + $0xd8] sm:$0xff] }
 0x3ba   :  { %v1369_v41 = vmul.f32 %v2158_v59, %v1368_v21  ;;  %v1382_v45 = vmul.f32 %v1364_v32, %v3165_v35  ;;  %v3176_v35 = vld [vmem:[#allocation7 + $0x1e0] sm:$0xff]  ;;  %1713 = vmatpush.msrb.mxu2 %v3264_v40  ;;  %1735 = vmatpush.msrb.mxu3 %v3294_v52  ;;  %v3300_v53 = vld [vmem:[#allocation7 + $0xa8] sm:$0xff]  ;;  %v3302_v21 = vld [vmem:[#allocation7 + $0xb0] sm:$0xff] }
 0x3bb   :  { %1666 = vmatpush.msrb.mxu0 %v3176_v35  ;;  %1694 = vmatpush.msrb.mxu1 %v3274_v6  ;;  %v3306_v32 = vld [vmem:[#allocation7 + $0xb8] sm:$0xff] }
 0x3bc   :  { %v3173_v46 = vadd.f32 %v1383_v37, %v1382_v45  ;;  %v1370_v47 = vadd.f32 %v2158_v59, %v1369_v41  ;;  %1714 = vmatpush.msrb.mxu2 %v3276_v12  ;;  %1736 = vmatpush.msrb.mxu3 %v3306_v32  ;;  %v3310_v37 = vld [vmem:[#allocation7 + $0x80] sm:$0xff]  ;;  %v3312_v41 = vld [vmem:[#allocation7 + $0x88] sm:$0xff]  ;;  %v3314_v45 = vld [vmem:[#allocation7 + $0x90] sm:$0xff] }
 0x3bd   :  { %1667 = vmatpush.msrb.mxu0 %v3188_v5  ;;  %1695 = vmatpush.msrb.mxu1 %v3286_v58 }
 0x3be   :  { %2161 = vtanh.f32 %v3173_v46  ;;  %v1374_v39 = vsel %vm1373_vm10, %v2158_v59, %v1370_v47  ;;  %v3288_v59 = vld [vmem:[#allocation7 + $0xd0] sm:$0xff]  ;;  %v3318_v47 = vld [vmem:[#allocation7 + $0x98] sm:$0xff] }
 0x3bf   :  { %v1379_v0 = vsel %vm1376_vm11, %v1378_v24, %v1374_v39  ;;  %1668 = vmatpush.msrb.mxu0 %v3200_v10  ;;  %1715 = vmatpush.msrb.mxu2 %v3288_v59  ;;  %v3326_v39 = vld [vmem:[#allocation7 + $0x70] sm:$0xff]  ;;  %v3328_v24 = vld [vmem:[#allocation7 + $0x78] sm:$0xff] }
 0x3c0   :  { %1696 = vmatpush.msrb.mxu1 %v3300_v53  ;;  %1737 = vmatpush.msrb.mxu3 %v3318_v47  ;;  %3607 = vst [vmem:[#allocation50_spill] sm:$0xff] %v3326_v39 }
 0x3c1   :  { %1669 = vmatpush.msrb.mxu0 %v3212_v17  ;;  %1716 = vmatpush.msrb.mxu2 %v3302_v21  ;;  %3608 = vst [vmem:[#allocation51_spill] sm:$0xff] %v3328_v24 }
 0x3c2   :  { %1697 = vmatpush.msrb.mxu1 %v3312_v41  ;;  %1738 = vmatpush.msrb.mxu3 %v3328_v24 }
 0x3c3   :  { %1670 = vmatpush.msrb.mxu0 %v3224_v56  ;;  %1717 = vmatpush.msrb.mxu2 %v3314_v45 }
 0x3c4   :  { %v2162_v26 = vpop.eup %2161  ;;  %1698 = vmatpush.msrb.mxu1 %v3322_v44 }
 0x3c5   :  { %v1386_v23 = vmul.f32 %v2162_v26, %v1379_v0  ;;  %1671 = vmatpush.msrb.mxu0 %v3236_v61  ;;  %v3330_v26 = vld [vmem:[#allocation7 + $0x40] sm:$0xff]  ;;  %1718 = vmatpush.msrb.mxu2 %v3326_v39 }
 0x3c6   :  { %3609 = vst [vmem:[#allocation52_spill] sm:$0xff] %v3330_v26 }
 0x3c7   :  { %1388 = vst [vmem:[#allocation10 + $0x20] sm:$0xff] %v1386_v23  ;;  %1469 = vmatmul.f32.vlgmr.msra.gmra.mxu0 %v1386_v23  ;;  %1489 = vmatmul.f32.vlgmr.msra.gmra.mxu1 %v1386_v23 }
 0x3c8   :  { %1509 = vmatmul.f32.vlgmr.msra.gmra.mxu2 %v1386_v23  ;;  %1529 = vmatmul.f32.vlgmr.msra.gmra.mxu3 %v1386_v23  ;;  %v3334_v23 = vld [vmem:[#allocation7 + $0x48] sm:$0xff] }
 0x3c9   :  { %1672 = vmatpush.msrb.mxu0 %v3248_v8  ;;  %3610 = vst [vmem:[#allocation53_spill] sm:$0xff] %v3334_v23  ;;  %1699 = vmatpush.msrb.mxu1 %v3334_v23  ;;  %v3363_v23 = vld [vmem:[#allocation7 + $0x18] sm:$0xff] }
 0x3cb   :  { %1673 = vmatpush.msrb.mxu0 %v3260_v29 }
 0x3cd   :  { %1674 = vmatpush.msrb.mxu0 %v3272_v36 }
 0x3cf   :  { %1675 = vmatpush.msrb.mxu0 %v3284_v55 }
 0x3d1   :  { %1676 = vmatpush.msrb.mxu0 %v3298_v13 }
 0x3d3   :  { %1677 = vmatpush.msrb.mxu0 %v3310_v37 }
 0x3d5   :  { %1678 = vmatpush.msrb.mxu0 %v3320_v27 }
 0x3d7   :  { %1679 = vmatpush.msrb.mxu0 %v3330_v26  ;;  %v3361_v26 = vld [vmem:[#allocation7 + $0x10] sm:$0xff] }
 0x444   :  { %v1470_v50 = vpop.f32.mrf.mxu0  ;;  %v1490_v54 = vpop.f32.mrf.mxu1 }
 0x445   :  { %v1533_v63 = vadd.f32 %v1470_v50, %v3603_v62  ;;  %v1534_v22 = vadd.f32 %v1490_v54, %v3604_v7  ;;  %v3336_v50 = vld [vmem:[#allocation7 + $0x50] sm:$0xff]  ;;  %v3338_v54 = vld [vmem:[#allocation7 + $0x58] sm:$0xff]  ;;  %v3343_v7 = vld [vmem:[#allocation7 + $0x20] sm:$0xff] }
 0x446   :  { %v3611_v62 = vld [vmem:[#allocation25_spill] sm:$0xff]  ;;  %1719 = vmatpush.msrb.mxu2 %v3336_v50  ;;  %1739 = vmatpush.msrb.mxu3 %v3338_v54 }
 0x447   :  { %v2064_v25 = vmul.f32 -1.442695, %v1533_v63  ;;  %v2065_v43 = vmul.f32 -1.442695, %v1534_v22  ;;  %v3345_v22 = vld [vmem:[#allocation7 + $0x28] sm:$0xff]  ;;  %1680 = vmatpush.msrb.mxu0 %v3343_v7 }
 0x448   :  { %1700 = vmatpush.msrb.mxu1 %v3345_v22 }
 0x449   :  { %2163 = vpow2.f32 %v2064_v25  ;;  %v3349_v25 = vld [vmem:[#allocation7 + $0x30] sm:$0xff] }
 0x44a   :  { %2165 = vpow2.f32 %v2065_v43  ;;  %v3351_v43 = vld [vmem:[#allocation7 + $0x38] sm:$0xff]  ;;  %1720 = vmatpush.msrb.mxu2 %v3349_v25 }
 0x44b   :  { %v1510_v0 = vpop.f32.mrf.mxu2  ;;  %1740 = vmatpush.msrb.mxu3 %v3351_v43 }
 0x44c   :  { %v1535_v63 = vadd.f32 %v1510_v0, %v3611_v62  ;;  %v3355_v0 = vld [vmem:[#allocation7] sm:$0xff]  ;;  %v3357_v62 = vld [vmem:[#allocation7 + $0x8] sm:$0xff]  ;;  %1721 = vmatpush.msrb.mxu2 %v3361_v26 }
 0x44d   :  { %1681 = vmatpush.msrb.mxu0 %v3355_v0  ;;  %1701 = vmatpush.msrb.mxu1 %v3357_v62 }
 0x44e   :  { %v2066_v44 = vmul.f32 -1.442695, %v1535_v63  ;;  %1741 = vmatpush.msrb.mxu3 %v3363_v23  ;;  %1919 = vmatpush.msra.mxu2 %v3180_v14 }
 0x44f   :  { %v2164_v24 = vpop.eup %2163  ;;  %1879 = vmatpush.msra.mxu0 %v3176_v35  ;;  %1899 = vmatpush.msra.mxu1 %v3178_v3  ;;  %v3612_v3 = vld [vmem:[#allocation26_spill] sm:$0xff] }
 0x450   :  { %v2166_v39 = vpop.eup %2165  ;;  %v3365_v27 = vadd.f32 1.0, %v2164_v24  ;;  %2167 = vpow2.f32 %v2066_v44  ;;  %1939 = vmatpush.msra.mxu3 %v3184_v28  ;;  %v1530_v44 = vpop.f32.mrf.mxu3  ;;  %1920 = vmatpush.msra.mxu2 %v3192_v42 }
 0x451   :  { %v3369_v63 = vadd.f32 1.0, %v2166_v39  ;;  %1880 = vmatpush.msra.mxu0 %v3188_v5  ;;  %1900 = vmatpush.msra.mxu1 %v3190_v1  ;;  %v1536_v14 = vadd.f32 %v1530_v44, %v3612_v3 }
 0x452   :  { %2169 = vrcp.f32 %v3365_v27  ;;  %1940 = vmatpush.msra.mxu3 %v3196_v11  ;;  %1921 = vmatpush.msra.mxu2 %v3204_v16  ;;  %vm1554_vm14 = vweird.f32 %v3365_v27 }
 0x453   :  { %2171 = vrcp.f32 %v3369_v63  ;;  %1881 = vmatpush.msra.mxu0 %v3200_v10  ;;  %1901 = vmatpush.msra.mxu1 %v3202_v15  ;;  %v1560_v10 = vand.u32 2147483648, %v3365_v27  ;;  %v1575_v15 = vand.u32 2147483648, %v3369_v63  ;;  %vm1569_vm15 = vweird.f32 %v3369_v63 }
 0x454   :  { %1941 = vmatpush.msra.mxu3 %v3208_v19  ;;  %1922 = vmatpush.msra.mxu2 %v3216_v51  ;;  %v1558_v19 = vand.u32 2147483647, %v3365_v27 }
 0x455   :  { %1882 = vmatpush.msra.mxu0 %v3212_v17  ;;  %1902 = vmatpush.msra.mxu1 %v3214_v20  ;;  %v1573_v20 = vand.u32 2147483647, %v3369_v63 }
 0x456   :  { %v2168_v39 = vpop.eup %2167  ;;  %1942 = vmatpush.msra.mxu3 %v3220_v38  ;;  %1923 = vmatpush.msra.mxu2 %v3228_v60  ;;  %vm1559_vm2 = vcmp.eq.f32.partialorder %v1558_v19, 8.507059e+37 }
 0x457   :  { %v3385_v24 = vadd.f32 1.0, %v2168_v39  ;;  %1883 = vmatpush.msra.mxu0 %v3224_v56  ;;  %1903 = vmatpush.msra.mxu1 %v3226_v57  ;;  %v1561_v57 = vor.u32 1.1754944e-38, %v1560_v10  ;;  %vm1574_vm3 = vcmp.eq.f32.partialorder %v1573_v20, 8.507059e+37 }
 0x458   :  { %v2170_v35 = vpop.eup %2169  ;;  %1943 = vmatpush.msra.mxu3 %v3232_v34  ;;  %1924 = vmatpush.msra.mxu2 %v3240_v30  ;;  %v1576_v34 = vor.u32 1.1754944e-38, %v1575_v15 }
 0x459   :  { %v2172_v28 = vpop.eup %2171  ;;  %v1550_v5 = vmul.f32 %v2170_v35, %v3365_v27  ;;  %2173 = vrcp.f32 %v3385_v24  ;;  %vm1555_vm12 = vweird.f32 %v2170_v35  ;;  %1884 = vmatpush.msra.mxu0 %v3236_v61  ;;  %1904 = vmatpush.msra.mxu1 %v3238_v31  ;;  %vm1584_vm5 = vweird.f32 %v3385_v24 }
 0x45a   :  { %v1565_v1 = vmul.f32 %v2172_v28, %v3369_v63  ;;  %2175 = vtanh.f32 %v1536_v14  ;;  %vm1570_vm13 = vweird.f32 %v2172_v28  ;;  %1944 = vmatpush.msra.mxu3 %v3244_v48  ;;  %vm1556_vm0 = vmor %vm1554_vm14, %vm1555_vm12  ;;  %1925 = vmatpush.msra.mxu2 %v3252_v2 }
 0x45b   :  { %v1551_v42 = vsub.f32 1.0, %v1550_v5  ;;  %1885 = vmatpush.msra.mxu0 %v3248_v8  ;;  %1905 = vmatpush.msra.mxu1 %v3250_v9  ;;  %vm1571_vm1 = vmor %vm1569_vm15, %vm1570_vm13 }
 0x45c   :  { %v1566_v11 = vsub.f32 1.0, %v1565_v1  ;;  %1945 = vmatpush.msra.mxu3 %v3256_v4  ;;  %1926 = vmatpush.msra.mxu2 %v3264_v40 }
 0x45d   :  { %v1552_v16 = vmul.f32 %v2170_v35, %v1551_v42  ;;  %1886 = vmatpush.msra.mxu0 %v3260_v29  ;;  %1906 = vmatpush.msra.mxu1 %v3262_v18 }
 0x45e   :  { %v1567_v17 = vmul.f32 %v2172_v28, %v1566_v11  ;;  %1946 = vmatpush.msra.mxu3 %v3268_v33  ;;  %1927 = vmatpush.msra.mxu2 %v3276_v12  ;;  %v1588_v33 = vand.u32 2147483647, %v3385_v24  ;;  %v3614_v12 = vld [vmem:[#allocation49_spill] sm:$0xff] }
 0x45f   :  { %v3411_v51 = vpop.eup %2173  ;;  %v1553_v38 = vadd.f32 %v2170_v35, %v1552_v16  ;;  %1887 = vmatpush.msra.mxu0 %v3272_v36  ;;  %1907 = vmatpush.msra.mxu1 %v3274_v6  ;;  %v3613_v6 = vld [vmem:[#allocation48_spill] sm:$0xff] }
 0x460   :  { %v1580_v56 = vmul.f32 %v3411_v51, %v3385_v24  ;;  %v1568_v60 = vadd.f32 %v2172_v28, %v1567_v17  ;;  %v2176_v31 = vpop.eup %2175  ;;  %1947 = vmatpush.msra.mxu3 %v3280_v49  ;;  %1928 = vmatpush.msra.mxu2 %v3288_v59  ;;  %vm1585_vm4 = vweird.f32 %v3411_v51  ;;  %vm1589_vm7 = vcmp.eq.f32.partialorder %v1588_v33, 8.507059e+37  ;;  %v3617_v59 = vld [vmem:[#allocation52_spill] sm:$0xff] }
 0x461   :  { %v1557_v61 = vsel %vm1556_vm0, %v2170_v35, %v1553_v38  ;;  %1888 = vmatpush.msra.mxu0 %v3284_v55  ;;  %1908 = vmatpush.msra.mxu1 %v3286_v58  ;;  %vm1586_vm6 = vmor %vm1584_vm5, %vm1585_vm4  ;;  %v3615_v55 = vld [vmem:[#allocation50_spill] sm:$0xff]  ;;  %v3616_v58 = vld [vmem:[#allocation51_spill] sm:$0xff] }
 0x462   :  { %v1581_v30 = vsub.f32 1.0, %v1580_v56  ;;  %v1562_v48 = vsel %vm1559_vm2, %v1561_v57, %v1557_v61  ;;  %v1572_v8 = vsel %vm1571_vm1, %v2172_v28, %v1568_v60  ;;  %1948 = vmatpush.msra.mxu3 %v3294_v52  ;;  %1929 = vmatpush.msra.mxu2 %v3302_v21  ;;  %v3618_v52 = vld [vmem:[#allocation53_spill] sm:$0xff]  ;;  %v3622_v35 = vld [vmem:[#allocation30_spill] sm:$0xff] }
 0x463   :  { %v1577_v9 = vsel %vm1574_vm3, %v1576_v34, %v1572_v8  ;;  %v1596_v2 = vmul.f32 %v2176_v31, %v1562_v48  ;;  %1889 = vmatpush.msra.mxu0 %v3298_v13  ;;  %1909 = vmatpush.msra.mxu1 %v3300_v53 }
 0x464   :  { %v1582_v4 = vmul.f32 %v3411_v51, %v1581_v30  ;;  %v1595_v29 = vmul.f32 %v1577_v9, %v3173_v46  ;;  %v1590_v46 = vand.u32 2147483648, %v3385_v24  ;;  %1949 = vmatpush.msra.mxu3 %v3306_v32  ;;  %1930 = vmatpush.msra.mxu2 %v3314_v45 }
 0x465   :  { %1890 = vmatpush.msra.mxu0 %v3310_v37  ;;  %1910 = vmatpush.msra.mxu1 %v3312_v41  ;;  %v3619_v41 = vld [vmem:[#allocation27_spill] sm:$0xff] }
 0x466   :  { %v3435_v18 = vadd.f32 %v1596_v2, %v1595_v29  ;;  %v1583_v40 = vadd.f32 %v3411_v51, %v1582_v4  ;;  %1950 = vmatpush.msra.mxu3 %v3318_v47  ;;  %v1591_v49 = vor.u32 1.1754944e-38, %v1590_v46  ;;  %1931 = vmatpush.msra.mxu2 %v3615_v55  ;;  %v3620_v47 = vld [vmem:[#allocation28_spill] sm:$0xff] }
 0x467   :  { %1891 = vmatpush.msra.mxu0 %v3613_v6  ;;  %1911 = vmatpush.msra.mxu1 %v3614_v12 }
 0x468   :  { %2177 = vtanh.f32 %v3435_v18  ;;  %v1587_v36 = vsel %vm1586_vm6, %v3411_v51, %v1583_v40  ;;  %1951 = vmatpush.msra.mxu3 %v3616_v58  ;;  %1932 = vmatpush.msra.mxu2 %v3336_v50 }
 0x469   :  { %1892 = vmatpush.msra.mxu0 %v3617_v59  ;;  %1912 = vmatpush.msra.mxu1 %v3618_v52  ;;  %v1592_v53 = vsel %vm1589_vm7, %v1591_v49, %v1587_v36  ;;  %v3623_v59 = vld [vmem:[#allocation31_spill] sm:$0xff] }
 0x46a   :  { %1952 = vmatpush.msra.mxu3 %v3338_v54  ;;  %1933 = vmatpush.msra.mxu2 %v3349_v25 }
 0x46b   :  { %1893 = vmatpush.msra.mxu0 %v3343_v7  ;;  %1913 = vmatpush.msra.mxu1 %v3345_v22  ;;  %v3621_v22 = vld [vmem:[#allocation29_spill] sm:$0xff] }
 0x46c   :  { %1953 = vmatpush.msra.mxu3 %v3351_v43  ;;  %1934 = vmatpush.msra.mxu2 %v3361_v26 }
 0x46d   :  { %1894 = vmatpush.msra.mxu0 %v3355_v0  ;;  %1914 = vmatpush.msra.mxu1 %v3357_v62 }
 0x46e   :  { %v2178_v13 = vpop.eup %2177  ;;  %1954 = vmatpush.msra.mxu3 %v3363_v23 }
 0x46f   :  { %v1599_v21 = vmul.f32 %v2178_v13, %v1592_v53  ;;  %v3624_v13 = vld [vmem:[#allocation32_spill] sm:$0xff] }
 0x471   :  { %1601 = vst [vmem:[#allocation10 + $0x28] sm:$0xff] %v1599_v21  ;;  %1682 = vmatmul.f32.vlgmr.msrb.gmra.mxu0 %v1599_v21  ;;  %1702 = vmatmul.f32.vlgmr.msrb.gmra.mxu1 %v1599_v21 }
 0x472   :  { %1722 = vmatmul.f32.vlgmr.msrb.gmra.mxu2 %v1599_v21  ;;  %1742 = vmatmul.f32.vlgmr.msrb.gmra.mxu3 %v1599_v21 }
 0x4ee   :  { %v1683_v32 = vpop.f32.mrf.mxu0  ;;  %v1703_v37 = vpop.f32.mrf.mxu1 }
 0x4ef   :  { %v1746_v45 = vadd.f32 %v1683_v32, %v3619_v41  ;;  %v1747_v27 = vadd.f32 %v1703_v37, %v3620_v47  ;;  %v3625_v41 = vld [vmem:[#allocation33_spill] sm:$0xff] }
 0x4f1   :  { %v2067_v50 = vmul.f32 -1.442695, %v1746_v45  ;;  %v2068_v54 = vmul.f32 -1.442695, %v1747_v27 }
 0x4f3   :  { %2179 = vpow2.f32 %v2067_v50 }
 0x4f4   :  { %2181 = vpow2.f32 %v2068_v54 }
 0x4f5   :  { %v1723_v7 = vpop.f32.mrf.mxu2  ;;  %v1743_v23 = vpop.f32.mrf.mxu3 }
 0x4f6   :  { %v1748_v25 = vadd.f32 %v1723_v7, %v3621_v22  ;;  %v1749_v3 = vadd.f32 %v1743_v23, %v3622_v35 }
 0x4f8   :  { %v2069_v43 = vmul.f32 -1.442695, %v1748_v25 }
 0x4f9   :  { %v2180_v0 = vpop.eup %2179 }
 0x4fa   :  { %v2182_v62 = vpop.eup %2181  ;;  %v1759_v63 = vadd.f32 1.0, %v2180_v0  ;;  %2183 = vpow2.f32 %v2069_v43 }
 0x4fb   :  { %v1760_v26 = vadd.f32 1.0, %v2182_v62  ;;  %v3626_v62 = vld [vmem:[#allocation34_spill] sm:$0xff] }
 0x4fc   :  { %2185 = vrcp.f32 %v1759_v63  ;;  %v1773_v11 = vand.u32 2147483648, %v1759_v63  ;;  %v1771_v16 = vand.u32 2147483647, %v1759_v63  ;;  %vm1767_vm10 = vweird.f32 %v1759_v63 }
 0x4fd   :  { %2187 = vrcp.f32 %v1760_v26  ;;  %v1788_v10 = vand.u32 2147483648, %v1760_v26  ;;  %v1786_v17 = vand.u32 2147483647, %v1760_v26  ;;  %vm1782_vm11 = vweird.f32 %v1760_v26 }
 0x4fe   :  { %v1774_v56 = vor.u32 1.1754944e-38, %v1773_v11  ;;  %vm1772_vm14 = vcmp.eq.f32.partialorder %v1771_v16, 8.507059e+37 }
 0x4ff   :  { %v1789_v60 = vor.u32 1.1754944e-38, %v1788_v10  ;;  %vm1787_vm15 = vcmp.eq.f32.partialorder %v1786_v17, 8.507059e+37 }
 0x500   :  { %v2184_v44 = vpop.eup %2183 }
 0x501   :  { %v1761_v39 = vadd.f32 1.0, %v2184_v44 }
 0x502   :  { %v2186_v24 = vpop.eup %2185 }
 0x503   :  { %v2188_v14 = vpop.eup %2187  ;;  %v1763_v28 = vmul.f32 %v2186_v24, %v1759_v63  ;;  %2189 = vrcp.f32 %v1761_v39  ;;  %vm1768_vm8 = vweird.f32 %v2186_v24  ;;  %v1803_v46 = vand.u32 2147483648, %v1761_v39 }
 0x504   :  { %v1778_v5 = vmul.f32 %v2188_v14, %v1760_v26  ;;  %2191 = vtanh.f32 %v1749_v3  ;;  %vm1783_vm9 = vweird.f32 %v2188_v14  ;;  %vm1769_vm12 = vmor %vm1767_vm10, %vm1768_vm8  ;;  %vm1797_vm1 = vweird.f32 %v1761_v39 }
 0x505   :  { %v1764_v1 = vsub.f32 1.0, %v1763_v28  ;;  %vm1784_vm13 = vmor %vm1782_vm11, %vm1783_vm9  ;;  %v1801_v33 = vand.u32 2147483647, %v1761_v39  ;;  %v1804_v6 = vor.u32 1.1754944e-38, %v1803_v46 }
 0x506   :  { %v1779_v42 = vsub.f32 1.0, %v1778_v5 }
 0x507   :  { %v1765_v15 = vmul.f32 %v2186_v24, %v1764_v1  ;;  %vm1802_vm3 = vcmp.eq.f32.partialorder %v1801_v33, 8.507059e+37 }
 0x508   :  { %v1780_v19 = vmul.f32 %v2188_v14, %v1779_v42 }
 0x509   :  { %v2190_v20 = vpop.eup %2189  ;;  %v1766_v51 = vadd.f32 %v2186_v24, %v1765_v15 }
 0x50a   :  { %v1793_v38 = vmul.f32 %v2190_v20, %v1761_v39  ;;  %v1781_v57 = vadd.f32 %v2188_v14, %v1780_v19  ;;  %v2192_v61 = vpop.eup %2191  ;;  %vm1798_vm0 = vweird.f32 %v2190_v20 }
 0x50b   :  { %v1770_v34 = vsel %vm1769_vm12, %v2186_v24, %v1766_v51  ;;  %vm1799_vm2 = vmor %vm1797_vm1, %vm1798_vm0 }
 0x50c   :  { %v1794_v31 = vsub.f32 1.0, %v1793_v38  ;;  %v1775_v30 = vsel %vm1772_vm14, %v1774_v56, %v1770_v34  ;;  %v1785_v48 = vsel %vm1784_vm13, %v2188_v14, %v1781_v57 }
 0x50d   :  { %v1790_v8 = vsel %vm1787_vm15, %v1789_v60, %v1785_v48  ;;  %v1809_v9 = vmul.f32 %v2192_v61, %v1775_v30 }
 0x50e   :  { %v1795_v2 = vmul.f32 %v2190_v20, %v1794_v31  ;;  %v1808_v4 = vmul.f32 %v1790_v8, %v3435_v18 }
 0x510   :  { %v3475_v29 = vadd.f32 %v1809_v9, %v1808_v4  ;;  %v1796_v40 = vadd.f32 %v2190_v20, %v1795_v2 }
 0x512   :  { %2193 = vtanh.f32 %v3475_v29  ;;  %v1800_v36 = vsel %vm1799_vm2, %v2190_v20, %v1796_v40 }
 0x513   :  { %v1805_v49 = vsel %vm1802_vm3, %v1804_v6, %v1800_v36 }
 0x518   :  { %v2194_v12 = vpop.eup %2193 }
 0x519   :  { %v1812_v55 = vmul.f32 %v2194_v12, %v1805_v49 }
 0x51b   :  { %1814 = vst [vmem:[#allocation10 + $0x30] sm:$0xff] %v1812_v55  ;;  %1895 = vmatmul.f32.vlgmr.msra.gmra.mxu0 %v1812_v55  ;;  %1915 = vmatmul.f32.vlgmr.msra.gmra.mxu1 %v1812_v55 }
 0x51c   :  { %1935 = vmatmul.f32.vlgmr.msra.gmra.mxu2 %v1812_v55  ;;  %1955 = vmatmul.f32.vlgmr.msra.gmra.mxu3 %v1812_v55 }
 0x598   :  { %v1896_v18 = vpop.f32.mrf.mxu0  ;;  %v1916_v58 = vpop.f32.mrf.mxu1 }
 0x599   :  { %v1959_v52 = vadd.f32 %v1896_v18, %v3623_v59  ;;  %v1960_v53 = vadd.f32 %v1916_v58, %v3624_v13 }
 0x59b   :  { %v2070_v21 = vmul.f32 -1.442695, %v1959_v52  ;;  %v2071_v32 = vmul.f32 -1.442695, %v1960_v53 }
 0x59d   :  { %2195 = vpow2.f32 %v2070_v21 }
 0x59e   :  { %2197 = vpow2.f32 %v2071_v32 }
 0x59f   :  { %v1936_v37 = vpop.f32.mrf.mxu2  ;;  %v1956_v22 = vpop.f32.mrf.mxu3 }
 0x5a0   :  { %v1961_v45 = vadd.f32 %v1936_v37, %v3625_v41  ;;  %v1962_v63 = vadd.f32 %v1956_v22, %v3626_v62 }
 0x5a2   :  { %v2072_v47 = vmul.f32 -1.442695, %v1961_v45 }
 0x5a3   :  { %v2196_v27 = vpop.eup %2195 }
 0x5a4   :  { %v2198_v50 = vpop.eup %2197  ;;  %v1972_v54 = vadd.f32 1.0, %v2196_v27  ;;  %2199 = vpow2.f32 %v2072_v47 }
 0x5a5   :  { %v1973_v7 = vadd.f32 1.0, %v2198_v50 }
 0x5a6   :  { %2201 = vrcp.f32 %v1972_v54  ;;  %v1986_v35 = vand.u32 2147483648, %v1972_v54  ;;  %v1984_v28 = vand.u32 2147483647, %v1972_v54  ;;  %vm1980_vm6 = vweird.f32 %v1972_v54 }
 0x5a7   :  { %2203 = vrcp.f32 %v1973_v7  ;;  %v2001_v3 = vand.u32 2147483648, %v1973_v7  ;;  %v1999_v1 = vand.u32 2147483647, %v1973_v7  ;;  %vm1995_vm7 = vweird.f32 %v1973_v7 }
 0x5a8   :  { %v1987_v15 = vor.u32 1.1754944e-38, %v1986_v35  ;;  %vm1985_vm10 = vcmp.eq.f32.partialorder %v1984_v28, 8.507059e+37 }
 0x5a9   :  { %v2002_v19 = vor.u32 1.1754944e-38, %v2001_v3  ;;  %vm2000_vm11 = vcmp.eq.f32.partialorder %v1999_v1, 8.507059e+37 }
 0x5aa   :  { %v2200_v25 = vpop.eup %2199 }
 0x5ab   :  { %v1974_v43 = vadd.f32 1.0, %v2200_v25 }
 0x5ac   :  { %v2202_v0 = vpop.eup %2201 }
 0x5ad   :  { %v2204_v26 = vpop.eup %2203  ;;  %v1976_v23 = vmul.f32 %v2202_v0, %v1972_v54  ;;  %2205 = vrcp.f32 %v1974_v43  ;;  %vm1981_vm4 = vweird.f32 %v2202_v0  ;;  %v2016_v48 = vand.u32 2147483648, %v1974_v43 }
 0x5ae   :  { %v1991_v44 = vmul.f32 %v2204_v26, %v1973_v7  ;;  %2207 = vtanh.f32 %v1962_v63  ;;  %vm1996_vm5 = vweird.f32 %v2204_v26  ;;  %vm1982_vm8 = vmor %vm1980_vm6, %vm1981_vm4  ;;  %vm2010_vm13 = vweird.f32 %v1974_v43 }
 0x5af   :  { %v1977_v39 = vsub.f32 1.0, %v1976_v23  ;;  %vm1997_vm9 = vmor %vm1995_vm7, %vm1996_vm5  ;;  %v2014_v8 = vand.u32 2147483647, %v1974_v43  ;;  %v2017_v2 = vor.u32 1.1754944e-38, %v2016_v48 }
 0x5b0   :  { %v1992_v24 = vsub.f32 1.0, %v1991_v44 }
 0x5b1   :  { %v1978_v14 = vmul.f32 %v2202_v0, %v1977_v39  ;;  %vm2015_vm15 = vcmp.eq.f32.partialorder %v2014_v8, 8.507059e+37 }
 0x5b2   :  { %v1993_v5 = vmul.f32 %v2204_v26, %v1992_v24 }
 0x5b3   :  { %v2206_v42 = vpop.eup %2205  ;;  %v1979_v11 = vadd.f32 %v2202_v0, %v1978_v14 }
 0x5b4   :  { %v2006_v10 = vmul.f32 %v2206_v42, %v1974_v43  ;;  %v1994_v16 = vadd.f32 %v2204_v26, %v1993_v5  ;;  %v2208_v20 = vpop.eup %2207  ;;  %vm2011_vm12 = vweird.f32 %v2206_v42 }
 0x5b5   :  { %v1983_v17 = vsel %vm1982_vm8, %v2202_v0, %v1979_v11  ;;  %vm2012_vm14 = vmor %vm2010_vm13, %vm2011_vm12 }
 0x5b6   :  { %v2007_v51 = vsub.f32 1.0, %v2006_v10  ;;  %v1988_v38 = vsel %vm1985_vm10, %v1987_v15, %v1983_v17  ;;  %v1998_v56 = vsel %vm1997_vm9, %v2204_v26, %v1994_v16 }
 0x5b7   :  { %v2003_v57 = vsel %vm2000_vm11, %v2002_v19, %v1998_v56  ;;  %v2022_v60 = vmul.f32 %v2208_v20, %v1988_v38 }
 0x5b8   :  { %v2008_v34 = vmul.f32 %v2206_v42, %v2007_v51  ;;  %v2021_v61 = vmul.f32 %v2003_v57, %v3475_v29 }
 0x5ba   :  { %v2023_v31 = vadd.f32 %v2022_v60, %v2021_v61  ;;  %v2009_v30 = vadd.f32 %v2206_v42, %v2008_v34 }
 0x5bc   :  { %2209 = vtanh.f32 %v2023_v31  ;;  %v2013_v9 = vsel %vm2012_vm14, %v2206_v42, %v2009_v30 }
 0x5bd   :  { %v2018_v40 = vsel %vm2015_vm15, %v2017_v2, %v2013_v9 }
 0x5c2   :  { %v2210_v4 = vpop.eup %2209 }
 0x5c3   :  { %v2025_v29 = vmul.f32 %v2210_v4, %v2018_v40 }
 0x5c5   :  { %2027 = vst [vmem:[#allocation10 + $0x38] sm:$0xff] %v2025_v29 }
 0x5c6   :  { %2040 = dma.vmem_to_hbm [thread:$0]  %s2033_s3, 1024, %s2035_s13, [#allocation4], %s2343_s27, %s2343_s27, %s2344_s28  }
 0x5c7   :  { %2337 = dma.done.wait [#allocation4], 1024  }
 0x5c8   :  { %2338 = vsyncadd [#allocation4], 4294966272 }
 0x5c9   :  { %2045 = vsyncpa [#allocation3], 1 }
 0x5ca   :  { %2046 = vsyncpa [#allocation6], 1 }
 0x5cb   :  { %2047 = vsyncpa [#allocation9], 1 }
 0x5cc   :  { %2048 = vsyncpa [#allocation4], 1 }

</bundles_post_ra>
